<compile_context>
chip_gen: v5e
topology: v5e:2x2
jax: 0.10.0
libtpu: 0.0.40
codegen_flags: <defaults>
</compile_context>

<pallas_src>
import functools

import jax
import jax.numpy as jnp
from jax.experimental import pallas as pl
from jax.experimental.pallas import tpu as pltpu

_LANE = 128         # lane width: channel dims padded to this
_TM_DEFAULT = 512   # output-row tile (power-of-two multiple of 128)
_TK_DEFAULT = 2048  # reduction tile along the neighbor axis (power-of-two multiple of 128)


def _round_up(v, m):
    return (v + m - 1) // m * m


def _choose_tiles(n, tm_req=_TM_DEFAULT, tk_req=_TK_DEFAULT):
    """Shrink (power-of-two) tiles for small graphs; keep >=2 row blocks when possible
    so the 'parallel' grid axis can be split across v7x's two TensorCores."""
    n128 = _round_up(n, _LANE)
    tm = tm_req
    while tm > _LANE and tm > n128 // 2:
        tm //= 2
    tk = tk_req
    while tk > _LANE and tk > n128:
        tk //= 2
    # tm, tk are power-of-two multiples of 128 -> one divides the other.
    n_p = _round_up(n, max(tm, tk))
    return tm, tk, n_p


# ---------------------------------------------------------------------------
# Kernel: one SAGEConv layer, tiled over (row-block i, reduction-block k).
#   acc[i]  = sum_k A01[i,k] @ X[k]                        (int8 -> bf16, f32 accumulate)
#   out[i]  = (acc[i]*inv_deg[i]) @ W_l + X_self[i] @ W_r + b   (+ ReLU)  at k == last
# ---------------------------------------------------------------------------
def _sage_conv_kernel(a_ref, xnb_ref, xself_ref, invdeg_ref, wl_ref, wr_ref, b_ref,
                      o_ref, acc_ref, *, apply_relu):
    k = pl.program_id(1)

    @pl.when(k == 0)
    def _init():
        acc_ref[...] = jnp.zeros_like(acc_ref)

    # Neighbor sum-aggregation: upcast the int8 0/1 tile on the VPU, MXU dot in bf16,
    # accumulate in f32.
    a_tile = a_ref[...].astype(jnp.bfloat16)
    acc_ref[...] += jnp.dot(a_tile, xnb_ref[...], preferred_element_type=jnp.float32)

    @pl.when(k == pl.num_programs(1) - 1)
    def _epilogue():
        # Exact f32 mean normalization, then two bf16 weight matmuls (no concatenate).
        agg = (acc_ref[...] * invdeg_ref[...]).astype(jnp.bfloat16)
        out = jnp.dot(agg, wl_ref[...], preferred_element_type=jnp.float32)
        out += jnp.dot(xself_ref[...], wr_ref[...], preferred_element_type=jnp.float32)
        out = out + b_ref[...]
        if apply_relu:
            out = jnp.maximum(out, 0.0)
        o_ref[...] = out.astype(o_ref.dtype)


def sage_conv_pallas(a01, x_bf16, inv_deg, w_l, w_r, b, *, apply_relu, out_dtype, tm, tk):
    """One SAGEConv layer.  Inputs are already padded:
       a01 [Np,Np] int8 edge counts, x_bf16 [Np,Cin_p] bf16 (used for neighbor AND self
       streams), inv_deg [Np,1] f32, w_l/w_r [Cin_p,Cout_p] bf16, b [1,Cout_p] f32."""
    n_p = a01.shape[0]
    c_in_p = x_bf16.shape[1]
    c_out_p = w_l.shape[1]
    assert n_p % tm == 0 and n_p % tk == 0
    assert c_in_p % _LANE == 0 and c_out_p % _LANE == 0

    grid = (n_p // tm, n_p // tk)
    kernel = functools.partial(_sage_conv_kernel, apply_relu=apply_relu)

    out_bytes = n_p * c_out_p * jnp.dtype(out_dtype).itemsize
    cost = pl.CostEstimate(
        flops=2 * n_p * n_p * c_in_p + 2 * n_p * (2 * c_in_p) * c_out_p,
        transcendentals=0,
        bytes_accessed=(a01.size                          # int8 A stream (1 B/elem)
                        + grid[0] * x_bf16.size * 2       # X neighbors re-streamed per row block
                        + x_bf16.size * 2                 # X self stream
                        + inv_deg.size * 4
                        + (w_l.size + w_r.size) * 2 + b.size * 4
                        + out_bytes),
    )

    return pl.pallas_call(
        kernel,
        out_shape=jax.ShapeDtypeStruct((n_p, c_out_p), out_dtype),
        grid_spec=pltpu.PrefetchScalarGridSpec(
            num_scalar_prefetch=0,
            grid=grid,
            in_specs=[
                # A01 tile (int8): rows follow i, reduction follows k.
                pl.BlockSpec((tm, tk), lambda i, k: (i, k)),
                # Neighbor features (bf16): rows follow the reduction index k.
                pl.BlockSpec((tk, c_in_p), lambda i, k: (k, 0)),
                # Self features (bf16, same array): rows follow i (resident across k).
                pl.BlockSpec((tm, c_in_p), lambda i, k: (i, 0)),
                # Per-row exact 1/in-degree.
                pl.BlockSpec((tm, 1), lambda i, k: (i, 0)),
                # Resident weights and bias.
                pl.BlockSpec((c_in_p, c_out_p), lambda i, k: (0, 0)),
                pl.BlockSpec((c_in_p, c_out_p), lambda i, k: (0, 0)),
                pl.BlockSpec((1, c_out_p), lambda i, k: (0, 0)),
            ],
            out_specs=pl.BlockSpec((tm, c_out_p), lambda i, k: (i, 0)),
            scratch_shapes=[pltpu.VMEM((tm, c_in_p), jnp.float32)],
        ),
        compiler_params=pltpu.CompilerParams(
            dimension_semantics=("parallel", "arbitrary"),
        ),
        cost_estimate=cost,
    )(a01, x_bf16, x_bf16, inv_deg, w_l, w_r, b)


# ---------------------------------------------------------------------------
# Plain-JAX glue: padded int8 adjacency, degrees, weight padding.
# ---------------------------------------------------------------------------
def _pack_layer(w_l, w_r, b, c_in_p, c_out_p):
    """Zero-pad channel dims to lane width; weights stored bf16, bias f32."""
    c_in, c_out = w_l.shape

    def pad_w(w):
        return jnp.pad(w, ((0, c_in_p - c_in), (0, c_out_p - c_out))).astype(jnp.bfloat16)

    b_p = jnp.pad(b.reshape(1, -1), ((0, 0), (0, c_out_p - c_out))).astype(jnp.float32)
    return pad_w(w_l), pad_w(w_r), b_p


def graphsage_forward(x, edge_index, params, *, tm=_TM_DEFAULT, tk=_TK_DEFAULT):
    """GraphSAGE forward: conv1 -> ReLU -> conv2 (both layers as tiled Pallas kernels)."""
    n, c_in = x.shape
    c_hid = params["w_l1"].shape[1]
    c_out = params["w_l2"].shape[1]

    tm, tk, n_p = _choose_tiles(n, tm, tk)
    c_in_p = _round_up(c_in, _LANE)
    c_hid_p = _round_up(c_hid, _LANE)
    c_out_p = _round_up(c_out, _LANE)

    src, dst = edge_index[0], edge_index[1]
    # Edge-count adjacency, built already padded and already int8 (single N^2 pass).
    # Note: per-(i,j) edge multiplicity is capped at 127 by int8.
    a01 = jnp.zeros((n_p, n_p), jnp.int8).at[dst, src].add(jnp.int8(1))
    # Exact f32 1/in-degree (0-degree rows -> 1, so agg stays 0); computed O(E).
    deg = jnp.zeros((n_p,), jnp.float32).at[dst].add(1.0)
    inv_deg = (1.0 / jnp.maximum(deg, 1.0)).reshape(n_p, 1)

    # Padded rows/cols of A are zero, so padded nodes never contaminate real rows; padded
    # rows do pick up bias/ReLU in layer 1, which is harmless and sliced off below.
    x_p = jnp.pad(x, ((0, n_p - n), (0, c_in_p - c_in))).astype(jnp.bfloat16)

    wl1, wr1, b1 = _pack_layer(params["w_l1"], params["w_r1"], params["b1"], c_in_p, c_hid_p)
    wl2, wr2, b2 = _pack_layer(params["w_l2"], params["w_r2"], params["b2"], c_hid_p, c_out_p)

    h = sage_conv_pallas(a01, x_p, inv_deg, wl1, wr1, b1,
                         apply_relu=True, out_dtype=jnp.bfloat16, tm=tm, tk=tk)
    out_p = sage_conv_pallas(a01, h, inv_deg, wl2, wr2, b2,
                             apply_relu=False, out_dtype=jnp.float32, tm=tm, tk=tk)
    return out_p[:n, :c_out]


def graphsage_reference(x, edge_index, params):
    """Pure-JAX f32 reference for correctness checking."""
    n = x.shape[0]
    src, dst = edge_index[0], edge_index[1]
    adj = jnp.zeros((n, n), jnp.float32).at[dst, src].add(1.0)
    a = adj / jnp.maximum(jnp.sum(adj, axis=1, keepdims=True), 1.0)
    h = (a @ x) @ params["w_l1"] + x @ params["w_r1"] + params["b1"]
    h = jnp.maximum(h, 0.0)
    return (a @ h) @ params["w_l2"] + h @ params["w_r2"] + params["b2"]


def init_params(key, in_channels, hidden_channels, out_channels):
    """Deterministic Glorot-style init matching SAGEConv parameter shapes."""
    k1, k2, k3, k4 = jax.random.split(key, 4)

    def glorot(k, fan_in, fan_out):
        lim = (6.0 / (fan_in + fan_out)) ** 0.5
        return jax.random.uniform(k, (fan_in, fan_out), jnp.float32, -lim, lim)

    return {
        "w_l1": glorot(k1, in_channels, hidden_channels),
        "w_r1": glorot(k2, in_channels, hidden_channels),
        "b1": jnp.zeros((1, hidden_channels), jnp.float32),
        "w_l2": glorot(k3, hidden_channels, out_channels),
        "w_r2": glorot(k4, hidden_channels, out_channels),
        "b2": jnp.zeros((1, out_channels), jnp.float32),
    }


if __name__ == "__main__":
    key = jax.random.PRNGKey(0)
    k_x, k_e, k_p = jax.random.split(key, 3)

    num_nodes = 200          # pads to 256 -> tm=128, tk=256, grid (2, 1): exercises tiling
    in_channels = 8
    hidden_channels = 16
    out_channels = 8
    num_edges = 800

    x = jax.random.normal(k_x, (num_nodes, in_channels), dtype=jnp.float32)
    edge_index = jax.random.randint(k_e, (2, num_edges), 0, num_nodes, dtype=jnp.int32)
    params = init_params(k_p, in_channels, hidden_channels, out_channels)

    out = jax.jit(graphsage_forward)(x, edge_index, params)
    jax.block_until_ready(out)

    assert out.shape == (num_nodes, out_channels)

    # Check vs f32 reference (X / h / weights are bf16 in the kernel; 1/deg is exact f32).
    ref = graphsage_reference(x, edge_index, params)
    rel_err = jnp.linalg.norm(out - ref) / jnp.maximum(jnp.linalg.norm(ref), 1e-6)
    assert rel_err < 5e-2, f"relative error too large: {rel_err}"

    print("KERNEL_OK")
</pallas_src>

<mosaic_0001>
module attributes {stable_mosaic.version = 11 : i64} {
  func.func @_sage_conv_kernel(%arg0: i32, %arg1: i32, %arg2: memref<128x256xi8, #tpu.memory_space<vmem>>, %arg3: memref<256x128xbf16, #tpu.memory_space<vmem>>, %arg4: memref<128x128xbf16, #tpu.memory_space<vmem>>, %arg5: memref<128x1xf32, #tpu.memory_space<vmem>>, %arg6: memref<128x128xbf16, #tpu.memory_space<vmem>>, %arg7: memref<128x128xbf16, #tpu.memory_space<vmem>>, %arg8: memref<1x128xf32, #tpu.memory_space<vmem>>, %arg9: memref<128x128xbf16, #tpu.memory_space<vmem>>, %arg10: memref<128x128xf32, #tpu.memory_space<vmem>>) attributes {dimension_semantics = [#tpu.dimension_semantics<parallel>, #tpu.dimension_semantics<arbitrary>], iteration_bounds = array<i64: 2, 1>, scalar_prefetch = 0 : i64, scratch_operands = 1 : i64, tpu.core_type = #tpu.core_type<tc>, window_params = [{transform_indices = @transform_0, window_bounds = array<i64: 128, 256>}, {transform_indices = @transform_1, window_bounds = array<i64: 256, 128>}, {transform_indices = @transform_2, window_bounds = array<i64: 128, 128>}, {transform_indices = @transform_3, window_bounds = array<i64: 128, 1>}, {pipeline_mode = #tpu.pipeline_mode<synchronous>, transform_indices = @transform_4, window_bounds = array<i64: 128, 128>}, {pipeline_mode = #tpu.pipeline_mode<synchronous>, transform_indices = @transform_5, window_bounds = array<i64: 128, 128>}, {pipeline_mode = #tpu.pipeline_mode<synchronous>, transform_indices = @transform_6, window_bounds = array<i64: 1, 128>}, {transform_indices = @transform_7, window_bounds = array<i64: 128, 128>}]} {
    %c0_i32 = arith.constant 0 : i32
    %0 = arith.cmpi eq, %arg1, %c0_i32 : i32
    %1 = arith.extui %0 : i1 to i32
    %c0_i32_0 = arith.constant 0 : i32
    %2 = arith.cmpi ne, %1, %c0_i32_0 : i32
    scf.if %2 {
      %cst_10 = arith.constant 0.000000e+00 : f32
      %13 = vector.broadcast %cst_10 : f32 to vector<128x128xf32>
      %c0_11 = arith.constant 0 : index
      %c0_12 = arith.constant 0 : index
      %14 = vector.load %arg10[%c0_11, %c0_12] : memref<128x128xf32, #tpu.memory_space<vmem>>, vector<128x128xf32>
      tpu.vector_store %arg10[%c0_11, %c0_12], %13 {strides = array<i32>} : memref<128x128xf32, #tpu.memory_space<vmem>>, vector<128x128xf32>,
    } else {
    }
    %c0 = arith.constant 0 : index
    %c0_1 = arith.constant 0 : index
    %3 = vector.load %arg2[%c0, %c0_1] : memref<128x256xi8, #tpu.memory_space<vmem>>, vector<128x256xi8>
    %4 = arith.sitofp %3 : vector<128x256xi8> to vector<128x256xbf16>
    %c0_2 = arith.constant 0 : index
    %c0_3 = arith.constant 0 : index
    %5 = vector.load %arg10[%c0_2, %c0_3] : memref<128x128xf32, #tpu.memory_space<vmem>>, vector<128x128xf32>
    %c0_4 = arith.constant 0 : index
    %c0_5 = arith.constant 0 : index
    %6 = vector.load %arg3[%c0_4, %c0_5] : memref<256x128xbf16, #tpu.memory_space<vmem>>, vector<256x128xbf16>
    %cst = arith.constant dense<0.000000e+00> : vector<128x128xf32>
    %7 = tpu.matmul %4, %6, %cst {dimension_numbers = #tpu.dot_dimension_numbers<[1], [0], [0], [1], [0, 0, 1, 1], [], []>} : vector<128x256xbf16>, vector<256x128xbf16>, vector<128x128xf32> -> vector<128x128xf32>
    %8 = arith.addf %5, %7 : vector<128x128xf32>
    %c0_6 = arith.constant 0 : index
    %c0_7 = arith.constant 0 : index
    %9 = vector.load %arg10[%c0_6, %c0_7] : memref<128x128xf32, #tpu.memory_space<vmem>>, vector<128x128xf32>
    tpu.vector_store %arg10[%c0_6, %c0_7], %8 {strides = array<i32>} : memref<128x128xf32, #tpu.memory_space<vmem>>, vector<128x128xf32>,
    %c0_i32_8 = arith.constant 0 : i32
    %10 = arith.cmpi eq, %arg1, %c0_i32_8 : i32
    %11 = arith.extui %10 : i1 to i32
    %c0_i32_9 = arith.constant 0 : i32
    %12 = arith.cmpi ne, %11, %c0_i32_9 : i32
    scf.if %12 {
      %c0_10 = arith.constant 0 : index
      %c0_11 = arith.constant 0 : index
      %13 = vector.load %arg10[%c0_10, %c0_11] : memref<128x128xf32, #tpu.memory_space<vmem>>, vector<128x128xf32>
      %c0_12 = arith.constant 0 : index
      %c0_13 = arith.constant 0 : index
      %14 = vector.load %arg5[%c0_12, %c0_13] : memref<128x1xf32, #tpu.memory_space<vmem>>, vector<128x1xf32>
      %15 = vector.broadcast %14 : vector<128x1xf32> to vector<128x128xf32>
      %16 = arith.mulf %13, %15 : vector<128x128xf32>
      %17 = arith.truncf %16 : vector<128x128xf32> to vector<128x128xbf16>
      %c0_14 = arith.constant 0 : index
      %c0_15 = arith.constant 0 : index
      %18 = vector.load %arg6[%c0_14, %c0_15] : memref<128x128xbf16, #tpu.memory_space<vmem>>, vector<128x128xbf16>
      %cst_16 = arith.constant dense<0.000000e+00> : vector<128x128xf32>
      %19 = tpu.matmul %17, %18, %cst_16 {dimension_numbers = #tpu.dot_dimension_numbers<[1], [0], [0], [1], [0, 0, 1, 1], [], []>} : vector<128x128xbf16>, vector<128x128xbf16>, vector<128x128xf32> -> vector<128x128xf32>
      %c0_17 = arith.constant 0 : index
      %c0_18 = arith.constant 0 : index
      %20 = vector.load %arg4[%c0_17, %c0_18] : memref<128x128xbf16, #tpu.memory_space<vmem>>, vector<128x128xbf16>
      %c0_19 = arith.constant 0 : index
      %c0_20 = arith.constant 0 : index
      %21 = vector.load %arg7[%c0_19, %c0_20] : memref<128x128xbf16, #tpu.memory_space<vmem>>, vector<128x128xbf16>
      %cst_21 = arith.constant dense<0.000000e+00> : vector<128x128xf32>
      %22 = tpu.matmul %20, %21, %cst_21 {dimension_numbers = #tpu.dot_dimension_numbers<[1], [0], [0], [1], [0, 0, 1, 1], [], []>} : vector<128x128xbf16>, vector<128x128xbf16>, vector<128x128xf32> -> vector<128x128xf32>
      %23 = arith.addf %19, %22 : vector<128x128xf32>
      %c0_22 = arith.constant 0 : index
      %c0_23 = arith.constant 0 : index
      %24 = vector.load %arg8[%c0_22, %c0_23] : memref<1x128xf32, #tpu.memory_space<vmem>>, vector<1x128xf32>
      %25 = vector.broadcast %24 : vector<1x128xf32> to vector<128x128xf32>
      %26 = arith.addf %23, %25 : vector<128x128xf32>
      %cst_24 = arith.constant 0.000000e+00 : f32
      %27 = vector.broadcast %cst_24 : f32 to vector<128x128xf32>
      %28 = arith.maximumf %26, %27 : vector<128x128xf32>
      %29 = arith.truncf %28 : vector<128x128xf32> to vector<128x128xbf16>
      %c0_25 = arith.constant 0 : index
      %c0_26 = arith.constant 0 : index
      %30 = vector.load %arg9[%c0_25, %c0_26] : memref<128x128xbf16, #tpu.memory_space<vmem>>, vector<128x128xbf16>
      tpu.vector_store %arg9[%c0_25, %c0_26], %29 {strides = array<i32>} : memref<128x128xbf16, #tpu.memory_space<vmem>>, vector<128x128xbf16>,
    } else {
    }
    return
  }
  func.func @transform_0(%arg0: i32, %arg1: i32) -> (i32, i32) {
    %c0_i32 = arith.constant 0 : i32
    return %arg0, %arg1 : i32, i32
  }
  func.func @transform_1(%arg0: i32, %arg1: i32) -> (i32, i32) {
    %c0_i32 = arith.constant 0 : i32
    %c0_i32_0 = arith.constant 0 : i32
    return %arg1, %c0_i32 : i32, i32
  }
  func.func @transform_2(%arg0: i32, %arg1: i32) -> (i32, i32) {
    %c0_i32 = arith.constant 0 : i32
    %c0_i32_0 = arith.constant 0 : i32
    return %arg0, %c0_i32 : i32, i32
  }
  func.func @transform_3(%arg0: i32, %arg1: i32) -> (i32, i32) {
    %c0_i32 = arith.constant 0 : i32
    %c0_i32_0 = arith.constant 0 : i32
    return %arg0, %c0_i32 : i32, i32
  }
  func.func @transform_4(%arg0: i32, %arg1: i32) -> (i32, i32) {
    %c0_i32 = arith.constant 0 : i32
    %c0_i32_0 = arith.constant 0 : i32
    %c0_i32_1 = arith.constant 0 : i32
    return %c0_i32, %c0_i32_0 : i32, i32
  }
  func.func @transform_5(%arg0: i32, %arg1: i32) -> (i32, i32) {
    %c0_i32 = arith.constant 0 : i32
    %c0_i32_0 = arith.constant 0 : i32
    %c0_i32_1 = arith.constant 0 : i32
    return %c0_i32, %c0_i32_0 : i32, i32
  }
  func.func @transform_6(%arg0: i32, %arg1: i32) -> (i32, i32) {
    %c0_i32 = arith.constant 0 : i32
    %c0_i32_0 = arith.constant 0 : i32
    %c0_i32_1 = arith.constant 0 : i32
    return %c0_i32, %c0_i32_0 : i32, i32
  }
  func.func @transform_7(%arg0: i32, %arg1: i32) -> (i32, i32) {
    %c0_i32 = arith.constant 0 : i32
    %c0_i32_0 = arith.constant 0 : i32
    return %arg0, %c0_i32 : i32, i32
  }
}

module attributes {stable_mosaic.version = 11 : i64} {
  func.func @_sage_conv_kernel(%arg0: i32, %arg1: i32, %arg2: memref<128x256xi8, #tpu.memory_space<vmem>>, %arg3: memref<256x128xbf16, #tpu.memory_space<vmem>>, %arg4: memref<128x128xbf16, #tpu.memory_space<vmem>>, %arg5: memref<128x1xf32, #tpu.memory_space<vmem>>, %arg6: memref<128x128xbf16, #tpu.memory_space<vmem>>, %arg7: memref<128x128xbf16, #tpu.memory_space<vmem>>, %arg8: memref<1x128xf32, #tpu.memory_space<vmem>>, %arg9: memref<128x128xf32, #tpu.memory_space<vmem>>, %arg10: memref<128x128xf32, #tpu.memory_space<vmem>>) attributes {dimension_semantics = [#tpu.dimension_semantics<parallel>, #tpu.dimension_semantics<arbitrary>], iteration_bounds = array<i64: 2, 1>, scalar_prefetch = 0 : i64, scratch_operands = 1 : i64, tpu.core_type = #tpu.core_type<tc>, window_params = [{transform_indices = @transform_0, window_bounds = array<i64: 128, 256>}, {transform_indices = @transform_1, window_bounds = array<i64: 256, 128>}, {transform_indices = @transform_2, window_bounds = array<i64: 128, 128>}, {transform_indices = @transform_3, window_bounds = array<i64: 128, 1>}, {pipeline_mode = #tpu.pipeline_mode<synchronous>, transform_indices = @transform_4, window_bounds = array<i64: 128, 128>}, {pipeline_mode = #tpu.pipeline_mode<synchronous>, transform_indices = @transform_5, window_bounds = array<i64: 128, 128>}, {pipeline_mode = #tpu.pipeline_mode<synchronous>, transform_indices = @transform_6, window_bounds = array<i64: 1, 128>}, {transform_indices = @transform_7, window_bounds = array<i64: 128, 128>}]} {
    %c0_i32 = arith.constant 0 : i32
    %0 = arith.cmpi eq, %arg1, %c0_i32 : i32
    %1 = arith.extui %0 : i1 to i32
    %c0_i32_0 = arith.constant 0 : i32
    %2 = arith.cmpi ne, %1, %c0_i32_0 : i32
    scf.if %2 {
      %cst_10 = arith.constant 0.000000e+00 : f32
      %13 = vector.broadcast %cst_10 : f32 to vector<128x128xf32>
      %c0_11 = arith.constant 0 : index
      %c0_12 = arith.constant 0 : index
      %14 = vector.load %arg10[%c0_11, %c0_12] : memref<128x128xf32, #tpu.memory_space<vmem>>, vector<128x128xf32>
      tpu.vector_store %arg10[%c0_11, %c0_12], %13 {strides = array<i32>} : memref<128x128xf32, #tpu.memory_space<vmem>>, vector<128x128xf32>,
    } else {
    }
    %c0 = arith.constant 0 : index
    %c0_1 = arith.constant 0 : index
    %3 = vector.load %arg2[%c0, %c0_1] : memref<128x256xi8, #tpu.memory_space<vmem>>, vector<128x256xi8>
    %4 = arith.sitofp %3 : vector<128x256xi8> to vector<128x256xbf16>
    %c0_2 = arith.constant 0 : index
    %c0_3 = arith.constant 0 : index
    %5 = vector.load %arg10[%c0_2, %c0_3] : memref<128x128xf32, #tpu.memory_space<vmem>>, vector<128x128xf32>
    %c0_4 = arith.constant 0 : index
    %c0_5 = arith.constant 0 : index
    %6 = vector.load %arg3[%c0_4, %c0_5] : memref<256x128xbf16, #tpu.memory_space<vmem>>, vector<256x128xbf16>
    %cst = arith.constant dense<0.000000e+00> : vector<128x128xf32>
    %7 = tpu.matmul %4, %6, %cst {dimension_numbers = #tpu.dot_dimension_numbers<[1], [0], [0], [1], [0, 0, 1, 1], [], []>} : vector<128x256xbf16>, vector<256x128xbf16>, vector<128x128xf32> -> vector<128x128xf32>
    %8 = arith.addf %5, %7 : vector<128x128xf32>
    %c0_6 = arith.constant 0 : index
    %c0_7 = arith.constant 0 : index
    %9 = vector.load %arg10[%c0_6, %c0_7] : memref<128x128xf32, #tpu.memory_space<vmem>>, vector<128x128xf32>
    tpu.vector_store %arg10[%c0_6, %c0_7], %8 {strides = array<i32>} : memref<128x128xf32, #tpu.memory_space<vmem>>, vector<128x128xf32>,
    %c0_i32_8 = arith.constant 0 : i32
    %10 = arith.cmpi eq, %arg1, %c0_i32_8 : i32
    %11 = arith.extui %10 : i1 to i32
    %c0_i32_9 = arith.constant 0 : i32
    %12 = arith.cmpi ne, %11, %c0_i32_9 : i32
    scf.if %12 {
      %c0_10 = arith.constant 0 : index
      %c0_11 = arith.constant 0 : index
      %13 = vector.load %arg10[%c0_10, %c0_11] : memref<128x128xf32, #tpu.memory_space<vmem>>, vector<128x128xf32>
      %c0_12 = arith.constant 0 : index
      %c0_13 = arith.constant 0 : index
      %14 = vector.load %arg5[%c0_12, %c0_13] : memref<128x1xf32, #tpu.memory_space<vmem>>, vector<128x1xf32>
      %15 = vector.broadcast %14 : vector<128x1xf32> to vector<128x128xf32>
      %16 = arith.mulf %13, %15 : vector<128x128xf32>
      %17 = arith.truncf %16 : vector<128x128xf32> to vector<128x128xbf16>
      %c0_14 = arith.constant 0 : index
      %c0_15 = arith.constant 0 : index
      %18 = vector.load %arg6[%c0_14, %c0_15] : memref<128x128xbf16, #tpu.memory_space<vmem>>, vector<128x128xbf16>
      %cst_16 = arith.constant dense<0.000000e+00> : vector<128x128xf32>
      %19 = tpu.matmul %17, %18, %cst_16 {dimension_numbers = #tpu.dot_dimension_numbers<[1], [0], [0], [1], [0, 0, 1, 1], [], []>} : vector<128x128xbf16>, vector<128x128xbf16>, vector<128x128xf32> -> vector<128x128xf32>
      %c0_17 = arith.constant 0 : index
      %c0_18 = arith.constant 0 : index
      %20 = vector.load %arg4[%c0_17, %c0_18] : memref<128x128xbf16, #tpu.memory_space<vmem>>, vector<128x128xbf16>
      %c0_19 = arith.constant 0 : index
      %c0_20 = arith.constant 0 : index
      %21 = vector.load %arg7[%c0_19, %c0_20] : memref<128x128xbf16, #tpu.memory_space<vmem>>, vector<128x128xbf16>
      %cst_21 = arith.constant dense<0.000000e+00> : vector<128x128xf32>
      %22 = tpu.matmul %20, %21, %cst_21 {dimension_numbers = #tpu.dot_dimension_numbers<[1], [0], [0], [1], [0, 0, 1, 1], [], []>} : vector<128x128xbf16>, vector<128x128xbf16>, vector<128x128xf32> -> vector<128x128xf32>
      %23 = arith.addf %19, %22 : vector<128x128xf32>
      %c0_22 = arith.constant 0 : index
      %c0_23 = arith.constant 0 : index
      %24 = vector.load %arg8[%c0_22, %c0_23] : memref<1x128xf32, #tpu.memory_space<vmem>>, vector<1x128xf32>
      %25 = vector.broadcast %24 : vector<1x128xf32> to vector<128x128xf32>
      %26 = arith.addf %23, %25 : vector<128x128xf32>
      %c0_24 = arith.constant 0 : index
      %c0_25 = arith.constant 0 : index
      %27 = vector.load %arg9[%c0_24, %c0_25] : memref<128x128xf32, #tpu.memory_space<vmem>>, vector<128x128xf32>
      tpu.vector_store %arg9[%c0_24, %c0_25], %26 {strides = array<i32>} : memref<128x128xf32, #tpu.memory_space<vmem>>, vector<128x128xf32>,
    } else {
    }
    return
  }
  func.func @transform_0(%arg0: i32, %arg1: i32) -> (i32, i32) {
    %c0_i32 = arith.constant 0 : i32
    return %arg0, %arg1 : i32, i32
  }
  func.func @transform_1(%arg0: i32, %arg1: i32) -> (i32, i32) {
    %c0_i32 = arith.constant 0 : i32
    %c0_i32_0 = arith.constant 0 : i32
    return %arg1, %c0_i32 : i32, i32
  }
  func.func @transform_2(%arg0: i32, %arg1: i32) -> (i32, i32) {
    %c0_i32 = arith.constant 0 : i32
    %c0_i32_0 = arith.constant 0 : i32
    return %arg0, %c0_i32 : i32, i32
  }
  func.func @transform_3(%arg0: i32, %arg1: i32) -> (i32, i32) {
    %c0_i32 = arith.constant 0 : i32
    %c0_i32_0 = arith.constant 0 : i32
    return %arg0, %c0_i32 : i32, i32
  }
  func.func @transform_4(%arg0: i32, %arg1: i32) -> (i32, i32) {
    %c0_i32 = arith.constant 0 : i32
    %c0_i32_0 = arith.constant 0 : i32
    %c0_i32_1 = arith.constant 0 : i32
    return %c0_i32, %c0_i32_0 : i32, i32
  }
  func.func @transform_5(%arg0: i32, %arg1: i32) -> (i32, i32) {
    %c0_i32 = arith.constant 0 : i32
    %c0_i32_0 = arith.constant 0 : i32
    %c0_i32_1 = arith.constant 0 : i32
    return %c0_i32, %c0_i32_0 : i32, i32
  }
  func.func @transform_6(%arg0: i32, %arg1: i32) -> (i32, i32) {
    %c0_i32 = arith.constant 0 : i32
    %c0_i32_0 = arith.constant 0 : i32
    %c0_i32_1 = arith.constant 0 : i32
    return %c0_i32, %c0_i32_0 : i32, i32
  }
  func.func @transform_7(%arg0: i32, %arg1: i32) -> (i32, i32) {
    %c0_i32 = arith.constant 0 : i32
    %c0_i32_0 = arith.constant 0 : i32
    return %arg0, %c0_i32 : i32, i32
  }
}

</mosaic_0001>

<bundles_post_ra>
// kernel: graphsage_forward.3
= control target key start
LH: loop header
LB: loop body
LE: loop exit
PB: predicated region body
PF: predicated region fallthrough
CT: control target
= control target key end

     0   :  { %s1711_s24 = smov 0   ;;  %s1713_s25 = smov 0   ;;  %s1935_s0 = inlined_call_operand.vmem [shape: s8[256,256], index: 0, kind: input, shape index: {}]   ;;  %s1936_s1 = inlined_call_operand.vmem [shape: bf16[256,128], index: 1, kind: input, shape index: {}, may-alias: {1,2}]   ;;  %s1937_s2 = inlined_call_operand.vmem [shape: bf16[256,128], index: 2, kind: input, shape index: {}, may-alias: {1,2}]   ;;  %s1938_s3 = inlined_call_operand.vmem [shape: f32[256,1], index: 3, kind: input, shape index: {}]   ;;  %s1939_s4 = inlined_call_operand.vmem [shape: bf16[128,128], index: 4, kind: input, shape index: {}]   ;;  %s1940_s5 = inlined_call_operand.vmem [shape: bf16[128,128], index: 5, kind: input, shape index: {}]   ;;  %s1941_s6 = inlined_call_operand.vmem [shape: f32[1,128], index: 6, kind: input, shape index: {}]   ;;  %s1942_s7 = inlined_call_operand.vmem [shape: f32[256,128], index: 7, kind: output, shape index: {}]  }
   0x1   :  { %s1715_s26 = smov 0  }
   0x2 LB: > { %s29_s27 = sadd.s32 1, %s1664_s25  ;;  %p1349_p0 = scmp.ge.s32.totalorder %s1668_s26, 1  ;;  %s1668_s26 = sphi %s1715_s26, %s17_s26   ;;  %s1664_s25 = sphi %s1713_s25, %s1944_s25   ;;  %s1660_s24 = sphi %s1711_s24, %s1943_s24  }
   0x3   : > { %p31_p1 = scmp.ge.s32.totalorder %s29_s27, 2  ;;  %p291_p2 = scmp.lt.s32.totalorder %s1668_s26, 3 }
   0x5   : > { %s1946_s27 = smov (%p31_p1, %s29_s27), 0  ;;  %p292_p3 = pnand %p1349_p0, %p291_p2 }
   0x6   : > { %s1350_s9 = sshll.u32 (!%p292_p3), %s1660_s24, 4 }
   0x7   : > { %295 = sbr.rel (%p292_p3) target bundleno = 442 (0x1ba), region = 48  ;;  %p345_p4 = scmp.lt.s32.totalorder (!%p292_p3), %s1350_s9, 31 }
   0xc   : > { %v1529_v0 = vld [vmem:[%s1936_s1 + $0x38] sm:$0xff]  ;;  %v1670_v2 = vmov 0   ;;  %v1528_v3 = vld [vmem:[%s1936_s1 + $0x30] sm:$0xff]  ;;  %s1948_s9 = smov (!%p345_p4, %s1350_s9), 31  ;;  %v1527_v5 = vld [vmem:[%s1936_s1 + $0x28] sm:$0xff] }
   0xd   : > { %v1537_v1 = vld [vmem:[%s1936_s1 + $0x78] sm:$0xff]  ;;  %1642 = vset.pattern.permute.xlu0 %v1670_v2  ;;  %1643 = vset.pattern.permute.xlu1 %v1670_v2  ;;  %v1536_v4 = vld [vmem:[%s1936_s1 + $0x70] sm:$0xff]  ;;  %s1356_s14 = sshll.u32 %s1948_s9, 3  ;;  %v1535_v6 = vld [vmem:[%s1936_s1 + $0x68] sm:$0xff]  ;;  %s1521_s29 = sshll.u32 %s1948_s9, 2 }
   0xe   : > { %639 = vmatpush.bf16.msra.mxu0 %v1529_v0  ;;  %688 = vmatpush.bf16.msra.mxu1 %v1537_v1  ;;  %s1749_s17 = scalar_lea.vmem %s1938_s3, %s1356_s14  ;;  %v1526_v9 = vld [vmem:[%s1936_s1 + $0x20] sm:$0xff]  ;;  %v1525_v12 = vld [vmem:[%s1936_s1 + $0x18] sm:$0xff]  ;;  %s1779_s15 = scalar_lea.vmem %s1935_s0, %s1521_s29  ;;  %v1524_v15 = vld [vmem:[%s1936_s1 + $0x10] sm:$0xff] }
   0xf   : > { %1644 = vset.pattern.permute.xlu2 %v1670_v2  ;;  %v788_v7 = vld [vmem:[%s1749_s17] sm:$0xff]  ;;  %v790_v8 = vld [vmem:[%s1749_s17 + $0x10] sm:$0xff]  ;;  %v789_v11 = vld [vmem:[%s1749_s17 + $0x8] sm:$0xff]  ;;  %s1859_s23 = scalar_lea.vmem %s1937_s2, %s1521_s29  ;;  %s1892_s18 = scalar_lea.vmem %s1942_s7, %s1356_s14 }
  0x10   : > { %806 = vperm.xlu0 %1642, %v788_v7   ;;  %816 = vperm.xlu1 %1643, %v790_v8   ;;  %v1534_v10 = vld [vmem:[%s1936_s1 + $0x60] sm:$0xff]  ;;  %v1533_v13 = vld [vmem:[%s1936_s1 + $0x58] sm:$0xff]  ;;  %v1532_v16 = vld [vmem:[%s1936_s1 + $0x50] sm:$0xff] }
  0x11   : > { %v791_v14 = vld [vmem:[%s1749_s17 + $0x18] sm:$0xff]  ;;  %v1563_v17 = vld [vmem:[%s1779_s15] sm:$0xff]   ;;  %v794_v18 = vld [vmem:[%s1749_s17 + $0x30] sm:$0xff] }
  0x12   : > { %640 = vmatpush.bf16.msra.mxu0 %v1528_v3  ;;  %689 = vmatpush.bf16.msra.mxu1 %v1536_v4  ;;  %v1564_v19 = vunpack.c.0.s8 %v1563_v17  ;;  %v1566_v20 = vunpack.c.2.s8 %v1563_v17  ;;  %v1565_v21 = vunpack.c.1.s8 %v1563_v17  ;;  %v1567_v22 = vunpack.c.3.s8 %v1563_v17  ;;  %v1523_v23 = vld [vmem:[%s1936_s1 + $0x8] sm:$0xff]  ;;  %v795_v25 = vld [vmem:[%s1749_s17 + $0x38] sm:$0xff]  ;;  %v1522_v30 = vld [vmem:[%s1936_s1] sm:$0xff] }
  0x13   : > { %v1531_v24 = vld [vmem:[%s1936_s1 + $0x48] sm:$0xff]  ;;  %v1530_v31 = vld [vmem:[%s1936_s1 + $0x40] sm:$0xff]  ;;  %v798_v35 = vld [vmem:[%s1749_s17 + $0x50] sm:$0xff] }
  0x14   : > { %v447_v26 = vcvt.s32.f32 %v1564_v19  ;;  %v449_v27 = vcvt.s32.f32 %v1566_v20  ;;  %v448_v28 = vcvt.s32.f32 %v1565_v21  ;;  %v450_v29 = vcvt.s32.f32 %v1567_v22  ;;  %v797_v32 = vld [vmem:[%s1749_s17 + $0x48] sm:$0xff]  ;;  %v792_v36 = vld [vmem:[%s1749_s17 + $0x20] sm:$0xff]  ;;  %v803_v49 = vld [vmem:[%s1749_s17 + $0x78] sm:$0xff] }
  0x15   : > { %v1610_v37 = vld [vmem:[%s1779_s15 + $0x8] sm:$0xff]   ;;  %826 = vperm.xlu2 %1644, %v792_v36   ;;  %v800_v38 = vld [vmem:[%s1749_s17 + $0x60] sm:$0xff]  ;;  %v1611_v53 = vld [vmem:[%s1779_s15 + $0x10] sm:$0xff]  }
  0x16   : > { %641 = vmatpush.bf16.msra.mxu0 %v1527_v5  ;;  %690 = vmatpush.bf16.msra.mxu1 %v1535_v6  ;;  %v479_v33 = vpack.c.bf16 %v449_v27, %v447_v26  ;;  %v480_v34 = vpack.c.bf16 %v450_v29, %v448_v28  ;;  %v1570_v39 = vunpack.c.0.s8 %v1610_v37  ;;  %v1572_v40 = vunpack.c.2.s8 %v1610_v37  ;;  %v801_v43 = vld [vmem:[%s1749_s17 + $0x68] sm:$0xff]  ;;  %v796_v52 = vld [vmem:[%s1749_s17 + $0x40] sm:$0xff]  ;;  %v799_v58 = vld [vmem:[%s1749_s17 + $0x58] sm:$0xff] }
  0x17   : > { %v1571_v41 = vunpack.c.1.s8 %v1610_v37  ;;  %v1573_v42 = vunpack.c.3.s8 %v1610_v37  ;;  %v793_v44 = vld [vmem:[%s1749_s17 + $0x28] sm:$0xff]  ;;  %v1576_v54 = vunpack.c.0.s8 %v1611_v53  ;;  %v1578_v55 = vunpack.c.2.s8 %v1611_v53  ;;  %v802_v1 = vld [vmem:[%s1749_s17 + $0x70] sm:$0xff]  ;;  %v1612_v2 = vld [vmem:[%s1779_s15 + $0x18] sm:$0xff]  }
  0x18   : > { %811 = vperm.xlu0 %1642, %v789_v11   ;;  %821 = vperm.xlu1 %1643, %v791_v14   ;;  %v451_v45 = vcvt.s32.f32 %v1570_v39  ;;  %v453_v46 = vcvt.s32.f32 %v1572_v40  ;;  %v1577_v56 = vunpack.c.1.s8 %v1611_v53  ;;  %v1579_v57 = vunpack.c.3.s8 %v1611_v53  ;;  %v1545_v36 = vld [vmem:[%s1939_s4 + $0x38] sm:$0xff]  ;;  %v1558_v39 = vld [vmem:[%s1940_s5 + $0x20] sm:$0xff]  ;;  %v1544_v40 = vld [vmem:[%s1939_s4 + $0x30] sm:$0xff] }
  0x19   : > { %v452_v47 = vcvt.s32.f32 %v1571_v41  ;;  %v454_v48 = vcvt.s32.f32 %v1573_v42  ;;  %v455_v59 = vcvt.s32.f32 %v1576_v54  ;;  %v457_v60 = vcvt.s32.f32 %v1578_v55  ;;  %1149 = vmatpush.bf16.msra.mxu3 %v1545_v36  ;;  %v1615_v41 = vld [vmem:[%s1779_s15 + $0x30] sm:$0xff]   ;;  %v1557_v42 = vld [vmem:[%s1940_s5 + $0x18] sm:$0xff]  ;;  %v1555_v54 = vld [vmem:[%s1940_s5 + $0x8] sm:$0xff] }
  0x1a   : > { %642 = vmatpush.bf16.msra.mxu0 %v1526_v9  ;;  %691 = vmatpush.bf16.msra.mxu1 %v1534_v10  ;;  %v481_v50 = vpack.c.bf16 %v453_v46, %v451_v45  ;;  %v456_v61 = vcvt.s32.f32 %v1577_v56  ;;  %v458_v62 = vcvt.s32.f32 %v1579_v57  ;;  %v1582_v3 = vunpack.c.0.s8 %v1612_v2  ;;  %v1541_v55 = vld [vmem:[%s1939_s4 + $0x18] sm:$0xff] }
  0x1b   : > { %v482_v51 = vpack.c.bf16 %v454_v48, %v452_v47  ;;  %v483_v63 = vpack.c.bf16 %v457_v60, %v455_v59  ;;  %v1584_v4 = vunpack.c.2.s8 %v1612_v2  ;;  %v1583_v5 = vunpack.c.1.s8 %v1612_v2  ;;  %v1556_v48 = vld [vmem:[%s1940_s5 + $0x10] sm:$0xff]  ;;  %v1616_v60 = vld [vmem:[%s1779_s15 + $0x38] sm:$0xff]  }
  0x1c   : > { %v484_v0 = vpack.c.bf16 %v458_v62, %v456_v61  ;;  %v1585_v6 = vunpack.c.3.s8 %v1612_v2  ;;  %v459_v7 = vcvt.s32.f32 %v1582_v3  ;;  %v1602_v45 = vunpack.c.2.s8 %v1615_v41  ;;  %v1540_v59 = vld [vmem:[%s1939_s4 + $0x10] sm:$0xff]  ;;  %v1546_v61 = vld [vmem:[%s1859_s23] sm:$0xff]  ;;  %v1539_v62 = vld [vmem:[%s1939_s4 + $0x8] sm:$0xff] }
  0x1d   : > { %831 = vperm.xlu2 %1644, %v793_v44   ;;  %v461_v8 = vcvt.s32.f32 %v1584_v4  ;;  %v460_v9 = vcvt.s32.f32 %v1583_v5  ;;  %1150 = vmatpush.bf16.msra.mxu3 %v1544_v40  ;;  %v1600_v44 = vunpack.c.0.s8 %v1615_v41  ;;  %v1601_v46 = vunpack.c.1.s8 %v1615_v41  ;;  %v1538_v3 = vld [vmem:[%s1939_s4] sm:$0xff] }
  0x1e   : > { %643 = vmatpush.bf16.msra.mxu0 %v1525_v12  ;;  %692 = vmatpush.bf16.msra.mxu1 %v1533_v13  ;;  %v462_v10 = vcvt.s32.f32 %v1585_v6  ;;  %v1613_v13 = vld [vmem:[%s1779_s15 + $0x20] sm:$0xff]   ;;  %v1603_v47 = vunpack.c.3.s8 %v1615_v41  ;;  %v1609_v2 = vunpack.c.3.s8 %v1616_v60 }
  0x1f   : > { %v485_v11 = vpack.c.bf16 %v461_v8, %v459_v7  ;;  %v1588_v14 = vunpack.c.0.s8 %v1613_v13  ;;  %v1591_v17 = vunpack.c.3.s8 %v1613_v13 }
  0x20   : > { %836 = vperm.xlu0 %1642, %v794_v18   ;;  %841 = vperm.xlu1 %1643, %v795_v25   ;;  %v486_v12 = vpack.c.bf16 %v462_v10, %v460_v9  ;;  %v1561_v25 = vld [vmem:[%s1940_s5 + $0x38] sm:$0xff]  ;;  %v474_v53 = vcvt.s32.f32 %v1603_v47  ;;  %v478_v7 = vcvt.s32.f32 %v1609_v2  ;;  %v1547_v10 = vld [vmem:[%s1859_s23 + $0x8] sm:$0xff] }
  0x21   : > { %v463_v18 = vcvt.s32.f32 %v1588_v14  ;;  %v466_v21 = vcvt.s32.f32 %v1591_v17  ;;  %1052 = vmatpush.bf16.msra.mxu2 %v1561_v25  ;;  %v1548_v14 = vld [vmem:[%s1859_s23 + $0x10] sm:$0xff] }
  0x22   : > { %644 = vmatpush.bf16.msra.mxu0 %v1524_v15  ;;  %693 = vmatpush.bf16.msra.mxu1 %v1532_v16  ;;  %v1590_v15 = vunpack.c.2.s8 %v1613_v13  ;;  %v1589_v16 = vunpack.c.1.s8 %v1613_v13 }
  0x24   : > { %v465_v19 = vcvt.s32.f32 %v1590_v15  ;;  %v464_v20 = vcvt.s32.f32 %v1589_v16 }
  0x25   : > { %846 = vperm.xlu2 %1644, %v796_v52   ;;  %v472_v52 = vcvt.s32.f32 %v1601_v46 }
  0x26   : > { %645 = vmatpush.bf16.msra.mxu0 %v1523_v23  ;;  %694 = vmatpush.bf16.msra.mxu1 %v1531_v24  ;;  %v487_v22 = vpack.c.bf16 %v465_v19, %v463_v18  ;;  %v488_v23 = vpack.c.bf16 %v466_v21, %v464_v20  ;;  %v1614_v24 = vld [vmem:[%s1779_s15 + $0x28] sm:$0xff]  }
  0x27   : > { %v1594_v26 = vunpack.c.0.s8 %v1614_v24  ;;  %v1596_v27 = vunpack.c.2.s8 %v1614_v24  ;;  %v1595_v28 = vunpack.c.1.s8 %v1614_v24  ;;  %v1597_v29 = vunpack.c.3.s8 %v1614_v24 }
  0x28   : > { %851 = vperm.xlu0 %1642, %v797_v32   ;;  %856 = vperm.xlu1 %1643, %v798_v35   ;;  %v1559_v35 = vld [vmem:[%s1940_s5 + $0x28] sm:$0xff]  ;;  %v492_v57 = vpack.c.bf16 %v474_v53, %v472_v52 }
  0x29   : > { %v469_v32 = vcvt.s32.f32 %v1596_v27 }
  0x2a   : > { %646 = vmatpush.bf16.msra.mxu0 %v1522_v30  ;;  %695 = vmatpush.bf16.msra.mxu1 %v1530_v31  ;;  %v1560_v30 = vld [vmem:[%s1940_s5 + $0x30] sm:$0xff]  ;;  %v467_v31 = vcvt.s32.f32 %v1594_v26  ;;  %v1549_v26 = vld [vmem:[%s1859_s23 + $0x18] sm:$0xff] }
  0x2b   : > { %1053 = vmatpush.bf16.msra.mxu2 %v1560_v30 }
  0x2c   : > { %v489_v37 = vpack.c.bf16 %v469_v32, %v467_v31 }
  0x2d   : > { %647 = vmatmul.bf16.vlgmr.msra.gmra.mxu0 %v479_v33  ;;  %696 = vmatmul.bf16.vlgmr.msra.gmra.mxu1 %v480_v34  ;;  %v468_v33 = vcvt.s32.f32 %v1595_v28  ;;  %v470_v34 = vcvt.s32.f32 %v1597_v29 }
  0x2e   : > { %861 = vperm.xlu2 %1644, %v799_v58   ;;  %v1554_v58 = vld [vmem:[%s1940_s5] sm:$0xff] }
  0x2f   : > { %1054 = vmatpush.bf16.msra.mxu2 %v1559_v35 }
  0x30   : > { %866 = vperm.xlu0 %1642, %v800_v38   ;;  %871 = vperm.xlu1 %1643, %v801_v43   ;;  %v490_v38 = vpack.c.bf16 %v470_v34, %v468_v33  ;;  %v1543_v43 = vld [vmem:[%s1939_s4 + $0x28] sm:$0xff] }
  0x31   : > { %1151 = vmatpush.bf16.msra.mxu3 %v1543_v43 }
  0x33   : > { %1055 = vmatpush.bf16.msra.mxu2 %v1558_v39 }
  0x36   : > { %876 = vperm.xlu2 %1644, %v802_v1   ;;  %v1607_v1 = vunpack.c.1.s8 %v1616_v60 }
  0x37   : > { %1056 = vmatpush.bf16.msra.mxu2 %v1557_v42 }
  0x38   : > { %881 = vperm.xlu0 %1642, %v803_v49   ;;  %v1542_v49 = vld [vmem:[%s1939_s4 + $0x20] sm:$0xff]  ;;  %v476_v6 = vcvt.s32.f32 %v1607_v1 }
  0x39   : > { %1152 = vmatpush.bf16.msra.mxu3 %v1542_v49  ;;  %v1551_v49 = vld [vmem:[%s1859_s23 + $0x28] sm:$0xff] }
  0x3a   : > { %v494_v9 = vpack.c.bf16 %v478_v7, %v476_v6 }
  0x3b   : > { %1057 = vmatpush.bf16.msra.mxu2 %v1556_v48 }
  0x3d   : > { %652 = vmatmul.bf16.gmra.mxu0 %v481_v50  ;;  %701 = vmatmul.bf16.gmra.mxu1 %v482_v51  ;;  %v471_v50 = vcvt.s32.f32 %v1600_v44  ;;  %v473_v51 = vcvt.s32.f32 %v1602_v45 }
  0x3e   : > { %1153 = vmatpush.bf16.msra.mxu3 %v1541_v55 }
  0x3f   : > { %v491_v56 = vpack.c.bf16 %v473_v51, %v471_v50  ;;  %1058 = vmatpush.bf16.msra.mxu2 %v1555_v54 }
  0x42   : > { %1154 = vmatpush.bf16.msra.mxu3 %v1540_v59 }
  0x43   : > { %1059 = vmatpush.bf16.msra.mxu2 %v1554_v58 }
  0x46   : > { %1060 = vmatmul.bf16.vlgmr.msra.gmra.mxu2 %v1546_v61  ;;  %1155 = vmatpush.bf16.msra.mxu3 %v1539_v62  ;;  %v1552_v61 = vld [vmem:[%s1859_s23 + $0x30] sm:$0xff] }
  0x4a   : > { %1156 = vmatpush.bf16.msra.mxu3 %v1538_v3 }
  0x4d   : > { %657 = vmatmul.bf16.gmra.mxu0 %v483_v63  ;;  %706 = vmatmul.bf16.gmra.mxu1 %v484_v0  ;;  %v1606_v63 = vunpack.c.0.s8 %v1616_v60  ;;  %v1608_v0 = vunpack.c.2.s8 %v1616_v60 }
  0x4f   : > { %v475_v4 = vcvt.s32.f32 %v1606_v63  ;;  %v477_v5 = vcvt.s32.f32 %v1608_v0 }
  0x51   : > { %v493_v8 = vpack.c.bf16 %v477_v5, %v475_v4 }
  0x56   : > { %1065 = vmatmul.bf16.gmra.mxu2 %v1547_v10 }
  0x5d   : > { %662 = vmatmul.bf16.gmra.mxu0 %v485_v11  ;;  %711 = vmatmul.bf16.gmra.mxu1 %v486_v12 }
  0x66   : > { %1070 = vmatmul.bf16.gmra.mxu2 %v1548_v14 }
  0x6d   : > { %667 = vmatmul.bf16.gmra.mxu0 %v487_v22  ;;  %716 = vmatmul.bf16.gmra.mxu1 %v488_v23 }
  0x6f   : > { %v827_v35 = vpop.permute.xlu2 %826 }
  0x76   : > { %1075 = vmatmul.bf16.gmra.mxu2 %v1549_v26 }
  0x77   : > { %v832_v43 = vpop.permute.xlu2 %831 }
  0x7d   : > { %672 = vmatmul.bf16.gmra.mxu0 %v489_v37  ;;  %721 = vmatmul.bf16.gmra.mxu1 %v490_v38  ;;  %v1550_v38 = vld [vmem:[%s1859_s23 + $0x20] sm:$0xff] }
  0x7f   : > { %v847_v3 = vpop.permute.xlu2 %846 }
  0x82   : > { %v807_v11 = vpop.permute.xlu0 %806  ;;  %v817_v23 = vpop.permute.xlu1 %816 }
  0x86   : > { %1080 = vmatmul.bf16.gmra.mxu2 %v1550_v38 }
  0x8a   : > { %v812_v19 = vpop.permute.xlu0 %811  ;;  %v822_v31 = vpop.permute.xlu1 %821 }
  0x8d   : > { %677 = vmatmul.bf16.gmra.mxu0 %v491_v56  ;;  %726 = vmatmul.bf16.gmra.mxu1 %v492_v57 }
  0x92   : > { %v837_v54 = vpop.permute.xlu0 %836  ;;  %v842_v55 = vpop.permute.xlu1 %841 }
  0x96   : > { %1085 = vmatmul.bf16.gmra.mxu2 %v1551_v49 }
  0x9a   : > { %v852_v2 = vpop.permute.xlu0 %851  ;;  %v857_v14 = vpop.permute.xlu1 %856 }
  0x9d   : > { %682 = vmatmul.bf16.gmra.mxu0 %v493_v8  ;;  %731 = vmatmul.bf16.gmra.mxu1 %v494_v9  ;;  %v1553_v9 = vld [vmem:[%s1859_s23 + $0x38] sm:$0xff] }
  0xa2   : > { %v872_v26 = vpop.permute.xlu1 %871 }
  0xa6   : > { %1090 = vmatmul.bf16.gmra.mxu2 %v1552_v61 }
  0xaa   : > { %v648_v12 = vpop.f32.mrf.mxu0  ;;  %v697_v13 = vpop.f32.mrf.mxu1 }
  0xab   : > { %v698_v15 = vadd.f32 %v697_v13, %v648_v12 }
  0xad   : > { %v884_v20 = vmul.f32 %v807_v11, %v698_v15  ;;  %v862_v15 = vpop.permute.xlu2 %861 }
  0xb2   : > { %v650_v16 = vpop.f32.mrf.mxu0  ;;  %v699_v17 = vpop.f32.mrf.mxu1 }
  0xb3   : > { %v700_v18 = vadd.f32 %v699_v17, %v650_v16 }
  0xb5   : > { %v885_v21 = vmul.f32 %v812_v19, %v700_v18  ;;  %v877_v38 = vpop.permute.xlu2 %876 }
  0xb6   : > { %1095 = vmatmul.bf16.gmra.mxu2 %v1553_v9 }
  0xb7   : > { %v900_v22 = vpack.c.bf16 %v885_v21, %v884_v20 }
  0xb9   : > { %1157 = vmatmul.bf16.vlgmr.msra.gmra.mxu3 %v900_v22 }
  0xba   : > { %v653_v24 = vpop.f32.mrf.mxu0  ;;  %v702_v25 = vpop.f32.mrf.mxu1 }
  0xbb   : > { %v703_v27 = vadd.f32 %v702_v25, %v653_v24  ;;  %v867_v25 = vpop.permute.xlu0 %866 }
  0xbd   : > { %v886_v32 = vmul.f32 %v817_v23, %v703_v27 }
  0xc2   : > { %v655_v28 = vpop.f32.mrf.mxu0  ;;  %v704_v29 = vpop.f32.mrf.mxu1 }
  0xc3   : > { %v705_v30 = vadd.f32 %v704_v29, %v655_v28 }
  0xc5   : > { %v887_v33 = vmul.f32 %v822_v31, %v705_v30 }
  0xc7   : > { %v901_v34 = vpack.c.bf16 %v887_v33, %v886_v32 }
  0xc9   : > { %1162 = vmatmul.bf16.gmra.mxu3 %v901_v34  ;;  %v1061_v32 = vpop.f32.mrf.mxu2 }
  0xca   : > { %v658_v36 = vpop.f32.mrf.mxu0  ;;  %v707_v37 = vpop.f32.mrf.mxu1 }
  0xcb   : > { %v708_v39 = vadd.f32 %v707_v37, %v658_v36  ;;  %v882_v37 = vpop.permute.xlu0 %881 }
  0xcd   : > { %v888_v44 = vmul.f32 %v827_v35, %v708_v39 }
  0xd2   : > { %v660_v40 = vpop.f32.mrf.mxu0  ;;  %v709_v41 = vpop.f32.mrf.mxu1 }
  0xd3   : > { %v710_v42 = vadd.f32 %v709_v41, %v660_v40 }
  0xd5   : > { %v889_v45 = vmul.f32 %v832_v43, %v710_v42  ;;  %v1063_v42 = vpop.f32.mrf.mxu2 }
  0xd7   : > { %v902_v46 = vpack.c.bf16 %v889_v45, %v888_v44  ;;  %v1885_v44 = vld [vmem:[%s1941_s6] ss:$0 sm:$0xff] }
  0xd9   : > { %1167 = vmatmul.bf16.gmra.mxu3 %v902_v46 }
  0xda   : > { %v663_v47 = vpop.f32.mrf.mxu0  ;;  %v712_v48 = vpop.f32.mrf.mxu1 }
  0xdb   : > { %v713_v50 = vadd.f32 %v712_v48, %v663_v47 }
  0xdd   : > { %v890_v56 = vmul.f32 %v837_v54, %v713_v50  ;;  %v1066_v43 = vpop.f32.mrf.mxu2 }
  0xe2   : > { %v665_v51 = vpop.f32.mrf.mxu0  ;;  %v714_v52 = vpop.f32.mrf.mxu1 }
  0xe3   : > { %v715_v53 = vadd.f32 %v714_v52, %v665_v51 }
  0xe5   : > { %v891_v57 = vmul.f32 %v842_v55, %v715_v53  ;;  %v1068_v46 = vpop.f32.mrf.mxu2 }
  0xe7   : > { %v903_v58 = vpack.c.bf16 %v891_v57, %v890_v56 }
  0xe9   : > { %1172 = vmatmul.bf16.gmra.mxu3 %v903_v58 }
  0xea   : > { %v668_v59 = vpop.f32.mrf.mxu0  ;;  %v717_v60 = vpop.f32.mrf.mxu1 }
  0xeb   : > { %v718_v62 = vadd.f32 %v717_v60, %v668_v59 }
  0xed   : > { %v892_v4 = vmul.f32 %v847_v3, %v718_v62  ;;  %v1071_v51 = vpop.f32.mrf.mxu2 }
  0xf2   : > { %v670_v63 = vpop.f32.mrf.mxu0  ;;  %v719_v0 = vpop.f32.mrf.mxu1 }
  0xf3   : > { %v720_v1 = vadd.f32 %v719_v0, %v670_v63 }
  0xf5   : > { %v893_v5 = vmul.f32 %v852_v2, %v720_v1  ;;  %v1073_v56 = vpop.f32.mrf.mxu2 }
  0xf7   : > { %v904_v6 = vpack.c.bf16 %v893_v5, %v892_v4 }
  0xf9   : > { %1177 = vmatmul.bf16.gmra.mxu3 %v904_v6 }
  0xfa   : > { %v673_v7 = vpop.f32.mrf.mxu0  ;;  %v722_v8 = vpop.f32.mrf.mxu1 }
  0xfb   : > { %v723_v10 = vadd.f32 %v722_v8, %v673_v7 }
  0xfd   : > { %v894_v16 = vmul.f32 %v857_v14, %v723_v10  ;;  %v1076_v60 = vpop.f32.mrf.mxu2 }
 0x102   : > { %v675_v11 = vpop.f32.mrf.mxu0  ;;  %v724_v12 = vpop.f32.mrf.mxu1 }
 0x103   : > { %v725_v13 = vadd.f32 %v724_v12, %v675_v11 }
 0x105   : > { %v895_v17 = vmul.f32 %v862_v15, %v725_v13  ;;  %v1078_v1 = vpop.f32.mrf.mxu2 }
 0x107   : > { %v905_v18 = vpack.c.bf16 %v895_v17, %v894_v16 }
 0x109   : > { %1182 = vmatmul.bf16.gmra.mxu3 %v905_v18 }
 0x10a   : > { %v678_v19 = vpop.f32.mrf.mxu0  ;;  %v727_v20 = vpop.f32.mrf.mxu1 }
 0x10b   : > { %v728_v21 = vadd.f32 %v727_v20, %v678_v19 }
 0x10d   : > { %v896_v27 = vmul.f32 %v867_v25, %v728_v21  ;;  %v1081_v6 = vpop.f32.mrf.mxu2 }
 0x112   : > { %v680_v22 = vpop.f32.mrf.mxu0  ;;  %v729_v23 = vpop.f32.mrf.mxu1 }
 0x113   : > { %v730_v24 = vadd.f32 %v729_v23, %v680_v22 }
 0x115   : > { %v897_v28 = vmul.f32 %v872_v26, %v730_v24  ;;  %v1083_v11 = vpop.f32.mrf.mxu2 }
 0x117   : > { %v906_v29 = vpack.c.bf16 %v897_v28, %v896_v27 }
 0x119   : > { %1187 = vmatmul.bf16.gmra.mxu3 %v906_v29 }
 0x11a   : > { %v683_v30 = vpop.f32.mrf.mxu0  ;;  %v732_v31 = vpop.f32.mrf.mxu1 }
 0x11b   : > { %v733_v33 = vadd.f32 %v732_v31, %v683_v30 }
 0x11d   : > { %v898_v39 = vmul.f32 %v877_v38, %v733_v33  ;;  %v1086_v15 = vpop.f32.mrf.mxu2 }
 0x122   : > { %v685_v34 = vpop.f32.mrf.mxu0  ;;  %v734_v35 = vpop.f32.mrf.mxu1 }
 0x123   : > { %v735_v36 = vadd.f32 %v734_v35, %v685_v34 }
 0x125   : > { %v899_v40 = vmul.f32 %v882_v37, %v735_v36  ;;  %v1088_v19 = vpop.f32.mrf.mxu2 }
 0x127   : > { %v907_v41 = vpack.c.bf16 %v899_v40, %v898_v39 }
 0x129   : > { %1192 = vmatmul.bf16.gmra.mxu3 %v907_v41 }
 0x12d   : > { %v1091_v25 = vpop.f32.mrf.mxu2 }
 0x135   : > { %v1093_v30 = vpop.f32.mrf.mxu2 }
 0x13c   : > { %v1158_v45 = vpop.f32.mrf.mxu3 }
 0x13d   : > { %v1159_v47 = vadd.f32 %v1158_v45, %v1061_v32  ;;  %v1096_v34 = vpop.f32.mrf.mxu2 }
 0x13f   : > { %v1202_v48 = vadd.f32 %v1885_v44, %v1159_v47 }
 0x141   : > { %1218 = vst [vmem:[%s1892_s18] sm:$0xff] %v1202_v48 }
 0x144   : > { %v1160_v49 = vpop.f32.mrf.mxu3 }
 0x145   : > { %v1161_v50 = vadd.f32 %v1160_v49, %v1063_v42  ;;  %v1098_v38 = vpop.f32.mrf.mxu2 }
 0x147   : > { %v1203_v52 = vadd.f32 %v1885_v44, %v1161_v50 }
 0x149   : > { %1219 = vst [vmem:[%s1892_s18 + $0x8] sm:$0xff] %v1203_v52 }
 0x14c   : > { %v1163_v53 = vpop.f32.mrf.mxu3 }
 0x14d   : > { %v1164_v54 = vadd.f32 %v1163_v53, %v1066_v43 }
 0x14f   : > { %v1204_v55 = vadd.f32 %v1885_v44, %v1164_v54 }
 0x151   : > { %1220 = vst [vmem:[%s1892_s18 + $0x10] sm:$0xff] %v1204_v55 }
 0x154   : > { %v1165_v57 = vpop.f32.mrf.mxu3 }
 0x155   : > { %v1166_v58 = vadd.f32 %v1165_v57, %v1068_v46 }
 0x157   : > { %v1205_v59 = vadd.f32 %v1885_v44, %v1166_v58 }
 0x159   : > { %1221 = vst [vmem:[%s1892_s18 + $0x18] sm:$0xff] %v1205_v59 }
 0x15c   : > { %v1168_v61 = vpop.f32.mrf.mxu3 }
 0x15d   : > { %v1169_v62 = vadd.f32 %v1168_v61, %v1071_v51 }
 0x15f   : > { %v1206_v63 = vadd.f32 %v1885_v44, %v1169_v62 }
 0x161   : > { %1222 = vst [vmem:[%s1892_s18 + $0x20] sm:$0xff] %v1206_v63 }
 0x164   : > { %v1170_v0 = vpop.f32.mrf.mxu3 }
 0x165   : > { %v1171_v2 = vadd.f32 %v1170_v0, %v1073_v56 }
 0x167   : > { %v1207_v3 = vadd.f32 %v1885_v44, %v1171_v2 }
 0x169   : > { %1223 = vst [vmem:[%s1892_s18 + $0x28] sm:$0xff] %v1207_v3 }
 0x16c   : > { %v1173_v4 = vpop.f32.mrf.mxu3 }
 0x16d   : > { %v1174_v5 = vadd.f32 %v1173_v4, %v1076_v60 }
 0x16f   : > { %v1208_v7 = vadd.f32 %v1885_v44, %v1174_v5 }
 0x171   : > { %1224 = vst [vmem:[%s1892_s18 + $0x30] sm:$0xff] %v1208_v7 }
 0x174   : > { %v1175_v8 = vpop.f32.mrf.mxu3 }
 0x175   : > { %v1176_v9 = vadd.f32 %v1175_v8, %v1078_v1 }
 0x177   : > { %v1209_v10 = vadd.f32 %v1885_v44, %v1176_v9 }
 0x179   : > { %1225 = vst [vmem:[%s1892_s18 + $0x38] sm:$0xff] %v1209_v10 }
 0x17c   : > { %v1178_v12 = vpop.f32.mrf.mxu3 }
 0x17d   : > { %v1179_v13 = vadd.f32 %v1178_v12, %v1081_v6 }
 0x17f   : > { %v1210_v14 = vadd.f32 %v1885_v44, %v1179_v13 }
 0x181   : > { %1226 = vst [vmem:[%s1892_s18 + $0x40] sm:$0xff] %v1210_v14 }
 0x184   : > { %v1180_v16 = vpop.f32.mrf.mxu3 }
 0x185   : > { %v1181_v17 = vadd.f32 %v1180_v16, %v1083_v11 }
 0x187   : > { %v1211_v18 = vadd.f32 %v1885_v44, %v1181_v17 }
 0x189   : > { %1227 = vst [vmem:[%s1892_s18 + $0x48] sm:$0xff] %v1211_v18 }
 0x18c   : > { %v1183_v20 = vpop.f32.mrf.mxu3 }
 0x18d   : > { %v1184_v21 = vadd.f32 %v1183_v20, %v1086_v15 }
 0x18f   : > { %v1212_v22 = vadd.f32 %v1885_v44, %v1184_v21 }
 0x191   : > { %1228 = vst [vmem:[%s1892_s18 + $0x50] sm:$0xff] %v1212_v22 }
 0x194   : > { %v1185_v23 = vpop.f32.mrf.mxu3 }
 0x195   : > { %v1186_v24 = vadd.f32 %v1185_v23, %v1088_v19 }
 0x197   : > { %v1213_v26 = vadd.f32 %v1885_v44, %v1186_v24 }
 0x199   : > { %1229 = vst [vmem:[%s1892_s18 + $0x58] sm:$0xff] %v1213_v26 }
 0x19c   : > { %v1188_v27 = vpop.f32.mrf.mxu3 }
 0x19d   : > { %v1189_v28 = vadd.f32 %v1188_v27, %v1091_v25 }
 0x19f   : > { %v1214_v29 = vadd.f32 %v1885_v44, %v1189_v28 }
 0x1a1   : > { %1230 = vst [vmem:[%s1892_s18 + $0x60] sm:$0xff] %v1214_v29 }
 0x1a4   : > { %v1190_v31 = vpop.f32.mrf.mxu3 }
 0x1a5   : > { %v1191_v32 = vadd.f32 %v1190_v31, %v1093_v30 }
 0x1a7   : > { %v1215_v33 = vadd.f32 %v1885_v44, %v1191_v32 }
 0x1a9   : > { %1231 = vst [vmem:[%s1892_s18 + $0x68] sm:$0xff] %v1215_v33 }
 0x1ac   : > { %v1193_v35 = vpop.f32.mrf.mxu3 }
 0x1ad   : > { %v1194_v36 = vadd.f32 %v1193_v35, %v1096_v34 }
 0x1af   : > { %v1216_v37 = vadd.f32 %v1885_v44, %v1194_v36 }
 0x1b1   : > { %1232 = vst [vmem:[%s1892_s18 + $0x70] sm:$0xff] %v1216_v37 }
 0x1b4   : > { %v1195_v39 = vpop.f32.mrf.mxu3 }
 0x1b5   : > { %v1196_v40 = vadd.f32 %v1195_v39, %v1098_v38 }
 0x1b7   : > { %v1217_v41 = vadd.f32 %v1885_v44, %v1196_v40 }
 0x1b9   : > { %1233 = vst [vmem:[%s1892_s18 + $0x78] sm:$0xff] %v1217_v41 }
 0x1ba PF: > { %s17_s26 = sadd.s32 1, %s1668_s26   ;;  %s1943_s24 = smov %s1664_s25 }
 0x1bb   : > { %p14_p5 = scmp.ge.s32.totalorder %s17_s26, 4   ;;  %s1944_s25 = smov %s1946_s27 }
 0x1bd   :  { %16 = sbr.rel (!%p14_p5) target bundleno = 2 (0x2), region = 95 }

// kernel: graphsage_forward.2
= control target key start
LH: loop header
LB: loop body
LE: loop exit
PB: predicated region body
PF: predicated region fallthrough
CT: control target
= control target key end

     0   :  { %s1790_s24 = smov 0   ;;  %s1792_s25 = smov 0   ;;  %s1999_s0 = inlined_call_operand.vmem [shape: s8[256,256], index: 0, kind: input, shape index: {}]   ;;  %s2000_s1 = inlined_call_operand.vmem [shape: bf16[256,128], index: 1, kind: input, shape index: {}, may-alias: {1,2}]   ;;  %s2001_s2 = inlined_call_operand.vmem [shape: bf16[256,128], index: 2, kind: input, shape index: {}, may-alias: {1,2}]   ;;  %s2002_s3 = inlined_call_operand.vmem [shape: f32[256,1], index: 3, kind: input, shape index: {}]   ;;  %s2003_s4 = inlined_call_operand.vmem [shape: bf16[128,128], index: 4, kind: input, shape index: {}]   ;;  %s2004_s5 = inlined_call_operand.vmem [shape: bf16[128,128], index: 5, kind: input, shape index: {}]   ;;  %s2005_s6 = inlined_call_operand.vmem [shape: f32[1,128], index: 6, kind: input, shape index: {}]   ;;  %s2006_s7 = inlined_call_operand.vmem [shape: bf16[256,128], index: 7, kind: output, shape index: {}]  }
   0x1   :  { %s1794_s26 = smov 0  }
   0x2 LB: > { %s29_s27 = sadd.s32 1, %s1743_s25  ;;  %p1381_p0 = scmp.ge.s32.totalorder %s1747_s26, 1  ;;  %s1747_s26 = sphi %s1794_s26, %s17_s26   ;;  %s1743_s25 = sphi %s1792_s25, %s2008_s25   ;;  %s1739_s24 = sphi %s1790_s24, %s2007_s24  }
   0x3   : > { %p31_p1 = scmp.ge.s32.totalorder %s29_s27, 2  ;;  %p291_p2 = scmp.lt.s32.totalorder %s1747_s26, 3 }
   0x5   : > { %s2010_s27 = smov (%p31_p1, %s29_s27), 0  ;;  %p292_p3 = pnand %p1381_p0, %p291_p2 }
   0x6   : > { %s1382_s9 = sshll.u32 (!%p292_p3), %s1739_s24, 4 }
   0x7   : > { %295 = sbr.rel (%p292_p3) target bundleno = 446 (0x1be), region = 48  ;;  %p345_p4 = scmp.lt.s32.totalorder (!%p292_p3), %s1382_s9, 31 }
   0xc   : > { %v1561_v0 = vld [vmem:[%s2000_s1 + $0x38] sm:$0xff]  ;;  %v1749_v2 = vmov 0   ;;  %v1560_v3 = vld [vmem:[%s2000_s1 + $0x30] sm:$0xff]  ;;  %s2012_s9 = smov (!%p345_p4, %s1382_s9), 31  ;;  %v1559_v5 = vld [vmem:[%s2000_s1 + $0x28] sm:$0xff] }
   0xd   : > { %v1569_v1 = vld [vmem:[%s2000_s1 + $0x78] sm:$0xff]  ;;  %1721 = vset.pattern.permute.xlu0 %v1749_v2  ;;  %1722 = vset.pattern.permute.xlu1 %v1749_v2  ;;  %v1568_v4 = vld [vmem:[%s2000_s1 + $0x70] sm:$0xff]  ;;  %s1388_s14 = sshll.u32 %s2012_s9, 3  ;;  %v1567_v6 = vld [vmem:[%s2000_s1 + $0x68] sm:$0xff]  ;;  %s1839_s29 = sshll.u32 %s2012_s9, 2 }
   0xe   : > { %639 = vmatpush.bf16.msra.mxu0 %v1561_v0  ;;  %688 = vmatpush.bf16.msra.mxu1 %v1569_v1  ;;  %s1823_s17 = scalar_lea.vmem %s2002_s3, %s1388_s14  ;;  %v1558_v9 = vld [vmem:[%s2000_s1 + $0x20] sm:$0xff]  ;;  %v1557_v12 = vld [vmem:[%s2000_s1 + $0x18] sm:$0xff]  ;;  %s1853_s14 = scalar_lea.vmem %s1999_s0, %s1839_s29  ;;  %v1556_v15 = vld [vmem:[%s2000_s1 + $0x10] sm:$0xff] }
   0xf   : > { %1723 = vset.pattern.permute.xlu2 %v1749_v2  ;;  %v788_v7 = vld [vmem:[%s1823_s17] sm:$0xff]  ;;  %v790_v8 = vld [vmem:[%s1823_s17 + $0x10] sm:$0xff]  ;;  %v789_v11 = vld [vmem:[%s1823_s17 + $0x8] sm:$0xff]  ;;  %s1932_s16 = scalar_lea.vmem %s2001_s2, %s1839_s29  ;;  %s1966_s10 = scalar_lea.vmem %s2006_s7, %s1839_s29 }
  0x10   : > { %806 = vperm.xlu0 %1721, %v788_v7   ;;  %816 = vperm.xlu1 %1722, %v790_v8   ;;  %v1566_v10 = vld [vmem:[%s2000_s1 + $0x60] sm:$0xff]  ;;  %v1565_v13 = vld [vmem:[%s2000_s1 + $0x58] sm:$0xff]  ;;  %v1564_v16 = vld [vmem:[%s2000_s1 + $0x50] sm:$0xff] }
  0x11   : > { %v791_v14 = vld [vmem:[%s1823_s17 + $0x18] sm:$0xff]  ;;  %v1595_v17 = vld [vmem:[%s1853_s14] sm:$0xff]   ;;  %v794_v18 = vld [vmem:[%s1823_s17 + $0x30] sm:$0xff] }
  0x12   : > { %640 = vmatpush.bf16.msra.mxu0 %v1560_v3  ;;  %689 = vmatpush.bf16.msra.mxu1 %v1568_v4  ;;  %v1596_v19 = vunpack.c.0.s8 %v1595_v17  ;;  %v1598_v20 = vunpack.c.2.s8 %v1595_v17  ;;  %v1597_v21 = vunpack.c.1.s8 %v1595_v17  ;;  %v1599_v22 = vunpack.c.3.s8 %v1595_v17  ;;  %v1555_v23 = vld [vmem:[%s2000_s1 + $0x8] sm:$0xff]  ;;  %v795_v25 = vld [vmem:[%s1823_s17 + $0x38] sm:$0xff]  ;;  %v1554_v30 = vld [vmem:[%s2000_s1] sm:$0xff] }
  0x13   : > { %v1563_v24 = vld [vmem:[%s2000_s1 + $0x48] sm:$0xff]  ;;  %v1562_v31 = vld [vmem:[%s2000_s1 + $0x40] sm:$0xff]  ;;  %v798_v35 = vld [vmem:[%s1823_s17 + $0x50] sm:$0xff] }
  0x14   : > { %v447_v26 = vcvt.s32.f32 %v1596_v19  ;;  %v449_v27 = vcvt.s32.f32 %v1598_v20  ;;  %v448_v28 = vcvt.s32.f32 %v1597_v21  ;;  %v450_v29 = vcvt.s32.f32 %v1599_v22  ;;  %v797_v32 = vld [vmem:[%s1823_s17 + $0x48] sm:$0xff]  ;;  %v792_v36 = vld [vmem:[%s1823_s17 + $0x20] sm:$0xff]  ;;  %v803_v49 = vld [vmem:[%s1823_s17 + $0x78] sm:$0xff] }
  0x15   : > { %v1682_v37 = vld [vmem:[%s1853_s14 + $0x8] sm:$0xff]   ;;  %826 = vperm.xlu2 %1723, %v792_v36   ;;  %v800_v38 = vld [vmem:[%s1823_s17 + $0x60] sm:$0xff]  ;;  %v1683_v53 = vld [vmem:[%s1853_s14 + $0x10] sm:$0xff]  }
  0x16   : > { %641 = vmatpush.bf16.msra.mxu0 %v1559_v5  ;;  %690 = vmatpush.bf16.msra.mxu1 %v1567_v6  ;;  %v479_v33 = vpack.c.bf16 %v449_v27, %v447_v26  ;;  %v480_v34 = vpack.c.bf16 %v450_v29, %v448_v28  ;;  %v1602_v39 = vunpack.c.0.s8 %v1682_v37  ;;  %v1604_v40 = vunpack.c.2.s8 %v1682_v37  ;;  %v801_v43 = vld [vmem:[%s1823_s17 + $0x68] sm:$0xff]  ;;  %v796_v52 = vld [vmem:[%s1823_s17 + $0x40] sm:$0xff]  ;;  %v799_v58 = vld [vmem:[%s1823_s17 + $0x58] sm:$0xff] }
  0x17   : > { %v1603_v41 = vunpack.c.1.s8 %v1682_v37  ;;  %v1605_v42 = vunpack.c.3.s8 %v1682_v37  ;;  %v793_v44 = vld [vmem:[%s1823_s17 + $0x28] sm:$0xff]  ;;  %v1608_v54 = vunpack.c.0.s8 %v1683_v53  ;;  %v1610_v55 = vunpack.c.2.s8 %v1683_v53  ;;  %v802_v1 = vld [vmem:[%s1823_s17 + $0x70] sm:$0xff]  ;;  %v1684_v2 = vld [vmem:[%s1853_s14 + $0x18] sm:$0xff]  }
  0x18   : > { %811 = vperm.xlu0 %1721, %v789_v11   ;;  %821 = vperm.xlu1 %1722, %v791_v14   ;;  %v451_v45 = vcvt.s32.f32 %v1602_v39  ;;  %v453_v46 = vcvt.s32.f32 %v1604_v40  ;;  %v1609_v56 = vunpack.c.1.s8 %v1683_v53  ;;  %v1611_v57 = vunpack.c.3.s8 %v1683_v53  ;;  %v1577_v36 = vld [vmem:[%s2003_s4 + $0x38] sm:$0xff]  ;;  %v1590_v39 = vld [vmem:[%s2004_s5 + $0x20] sm:$0xff]  ;;  %v1576_v40 = vld [vmem:[%s2003_s4 + $0x30] sm:$0xff] }
  0x19   : > { %v452_v47 = vcvt.s32.f32 %v1603_v41  ;;  %v454_v48 = vcvt.s32.f32 %v1605_v42  ;;  %v455_v59 = vcvt.s32.f32 %v1608_v54  ;;  %v457_v60 = vcvt.s32.f32 %v1610_v55  ;;  %1149 = vmatpush.bf16.msra.mxu3 %v1577_v36  ;;  %v1687_v41 = vld [vmem:[%s1853_s14 + $0x30] sm:$0xff]   ;;  %v1589_v42 = vld [vmem:[%s2004_s5 + $0x18] sm:$0xff]  ;;  %v1587_v54 = vld [vmem:[%s2004_s5 + $0x8] sm:$0xff] }
  0x1a   : > { %642 = vmatpush.bf16.msra.mxu0 %v1558_v9  ;;  %691 = vmatpush.bf16.msra.mxu1 %v1566_v10  ;;  %v481_v50 = vpack.c.bf16 %v453_v46, %v451_v45  ;;  %v456_v61 = vcvt.s32.f32 %v1609_v56  ;;  %v458_v62 = vcvt.s32.f32 %v1611_v57  ;;  %v1614_v3 = vunpack.c.0.s8 %v1684_v2  ;;  %v1573_v55 = vld [vmem:[%s2003_s4 + $0x18] sm:$0xff] }
  0x1b   : > { %v482_v51 = vpack.c.bf16 %v454_v48, %v452_v47  ;;  %v483_v63 = vpack.c.bf16 %v457_v60, %v455_v59  ;;  %v1616_v4 = vunpack.c.2.s8 %v1684_v2  ;;  %v1615_v5 = vunpack.c.1.s8 %v1684_v2  ;;  %v1588_v48 = vld [vmem:[%s2004_s5 + $0x10] sm:$0xff]  ;;  %v1688_v60 = vld [vmem:[%s1853_s14 + $0x38] sm:$0xff]  }
  0x1c   : > { %v484_v0 = vpack.c.bf16 %v458_v62, %v456_v61  ;;  %v1617_v6 = vunpack.c.3.s8 %v1684_v2  ;;  %v459_v7 = vcvt.s32.f32 %v1614_v3  ;;  %v1634_v45 = vunpack.c.2.s8 %v1687_v41  ;;  %v1572_v59 = vld [vmem:[%s2003_s4 + $0x10] sm:$0xff]  ;;  %v1578_v61 = vld [vmem:[%s1932_s16] sm:$0xff]  ;;  %v1571_v62 = vld [vmem:[%s2003_s4 + $0x8] sm:$0xff] }
  0x1d   : > { %831 = vperm.xlu2 %1723, %v793_v44   ;;  %v461_v8 = vcvt.s32.f32 %v1616_v4  ;;  %v460_v9 = vcvt.s32.f32 %v1615_v5  ;;  %1150 = vmatpush.bf16.msra.mxu3 %v1576_v40  ;;  %v1632_v44 = vunpack.c.0.s8 %v1687_v41  ;;  %v1633_v46 = vunpack.c.1.s8 %v1687_v41  ;;  %v1570_v3 = vld [vmem:[%s2003_s4] sm:$0xff] }
  0x1e   : > { %643 = vmatpush.bf16.msra.mxu0 %v1557_v12  ;;  %692 = vmatpush.bf16.msra.mxu1 %v1565_v13  ;;  %v462_v10 = vcvt.s32.f32 %v1617_v6  ;;  %v1685_v13 = vld [vmem:[%s1853_s14 + $0x20] sm:$0xff]   ;;  %v1635_v47 = vunpack.c.3.s8 %v1687_v41  ;;  %v1641_v2 = vunpack.c.3.s8 %v1688_v60 }
  0x1f   : > { %v485_v11 = vpack.c.bf16 %v461_v8, %v459_v7  ;;  %v1620_v14 = vunpack.c.0.s8 %v1685_v13  ;;  %v1623_v17 = vunpack.c.3.s8 %v1685_v13 }
  0x20   : > { %836 = vperm.xlu0 %1721, %v794_v18   ;;  %841 = vperm.xlu1 %1722, %v795_v25   ;;  %v486_v12 = vpack.c.bf16 %v462_v10, %v460_v9  ;;  %v1593_v25 = vld [vmem:[%s2004_s5 + $0x38] sm:$0xff]  ;;  %v474_v53 = vcvt.s32.f32 %v1635_v47  ;;  %v478_v7 = vcvt.s32.f32 %v1641_v2  ;;  %v1579_v10 = vld [vmem:[%s1932_s16 + $0x8] sm:$0xff] }
  0x21   : > { %v463_v18 = vcvt.s32.f32 %v1620_v14  ;;  %v466_v21 = vcvt.s32.f32 %v1623_v17  ;;  %1052 = vmatpush.bf16.msra.mxu2 %v1593_v25  ;;  %v1580_v14 = vld [vmem:[%s1932_s16 + $0x10] sm:$0xff] }
  0x22   : > { %644 = vmatpush.bf16.msra.mxu0 %v1556_v15  ;;  %693 = vmatpush.bf16.msra.mxu1 %v1564_v16  ;;  %v1622_v15 = vunpack.c.2.s8 %v1685_v13  ;;  %v1621_v16 = vunpack.c.1.s8 %v1685_v13 }
  0x24   : > { %v465_v19 = vcvt.s32.f32 %v1622_v15  ;;  %v464_v20 = vcvt.s32.f32 %v1621_v16 }
  0x25   : > { %846 = vperm.xlu2 %1723, %v796_v52   ;;  %v472_v52 = vcvt.s32.f32 %v1633_v46 }
  0x26   : > { %645 = vmatpush.bf16.msra.mxu0 %v1555_v23  ;;  %694 = vmatpush.bf16.msra.mxu1 %v1563_v24  ;;  %v487_v22 = vpack.c.bf16 %v465_v19, %v463_v18  ;;  %v488_v23 = vpack.c.bf16 %v466_v21, %v464_v20  ;;  %v1686_v24 = vld [vmem:[%s1853_s14 + $0x28] sm:$0xff]  }
  0x27   : > { %v1626_v26 = vunpack.c.0.s8 %v1686_v24  ;;  %v1628_v27 = vunpack.c.2.s8 %v1686_v24  ;;  %v1627_v28 = vunpack.c.1.s8 %v1686_v24  ;;  %v1629_v29 = vunpack.c.3.s8 %v1686_v24 }
  0x28   : > { %851 = vperm.xlu0 %1721, %v797_v32   ;;  %856 = vperm.xlu1 %1722, %v798_v35   ;;  %v1591_v35 = vld [vmem:[%s2004_s5 + $0x28] sm:$0xff]  ;;  %v492_v57 = vpack.c.bf16 %v474_v53, %v472_v52 }
  0x29   : > { %v469_v32 = vcvt.s32.f32 %v1628_v27 }
  0x2a   : > { %646 = vmatpush.bf16.msra.mxu0 %v1554_v30  ;;  %695 = vmatpush.bf16.msra.mxu1 %v1562_v31  ;;  %v1592_v30 = vld [vmem:[%s2004_s5 + $0x30] sm:$0xff]  ;;  %v467_v31 = vcvt.s32.f32 %v1626_v26  ;;  %v1581_v26 = vld [vmem:[%s1932_s16 + $0x18] sm:$0xff] }
  0x2b   : > { %1053 = vmatpush.bf16.msra.mxu2 %v1592_v30 }
  0x2c   : > { %v489_v37 = vpack.c.bf16 %v469_v32, %v467_v31 }
  0x2d   : > { %647 = vmatmul.bf16.vlgmr.msra.gmra.mxu0 %v479_v33  ;;  %696 = vmatmul.bf16.vlgmr.msra.gmra.mxu1 %v480_v34  ;;  %v468_v33 = vcvt.s32.f32 %v1627_v28  ;;  %v470_v34 = vcvt.s32.f32 %v1629_v29 }
  0x2e   : > { %861 = vperm.xlu2 %1723, %v799_v58   ;;  %v1586_v58 = vld [vmem:[%s2004_s5] sm:$0xff] }
  0x2f   : > { %1054 = vmatpush.bf16.msra.mxu2 %v1591_v35 }
  0x30   : > { %866 = vperm.xlu0 %1721, %v800_v38   ;;  %871 = vperm.xlu1 %1722, %v801_v43   ;;  %v490_v38 = vpack.c.bf16 %v470_v34, %v468_v33  ;;  %v1575_v43 = vld [vmem:[%s2003_s4 + $0x28] sm:$0xff] }
  0x31   : > { %1151 = vmatpush.bf16.msra.mxu3 %v1575_v43 }
  0x33   : > { %1055 = vmatpush.bf16.msra.mxu2 %v1590_v39 }
  0x36   : > { %876 = vperm.xlu2 %1723, %v802_v1   ;;  %v1639_v1 = vunpack.c.1.s8 %v1688_v60 }
  0x37   : > { %1056 = vmatpush.bf16.msra.mxu2 %v1589_v42 }
  0x38   : > { %881 = vperm.xlu0 %1721, %v803_v49   ;;  %v1574_v49 = vld [vmem:[%s2003_s4 + $0x20] sm:$0xff]  ;;  %v476_v6 = vcvt.s32.f32 %v1639_v1 }
  0x39   : > { %1152 = vmatpush.bf16.msra.mxu3 %v1574_v49  ;;  %v1583_v49 = vld [vmem:[%s1932_s16 + $0x28] sm:$0xff] }
  0x3a   : > { %v494_v9 = vpack.c.bf16 %v478_v7, %v476_v6 }
  0x3b   : > { %1057 = vmatpush.bf16.msra.mxu2 %v1588_v48 }
  0x3d   : > { %652 = vmatmul.bf16.gmra.mxu0 %v481_v50  ;;  %701 = vmatmul.bf16.gmra.mxu1 %v482_v51  ;;  %v471_v50 = vcvt.s32.f32 %v1632_v44  ;;  %v473_v51 = vcvt.s32.f32 %v1634_v45 }
  0x3e   : > { %1153 = vmatpush.bf16.msra.mxu3 %v1573_v55 }
  0x3f   : > { %v491_v56 = vpack.c.bf16 %v473_v51, %v471_v50  ;;  %1058 = vmatpush.bf16.msra.mxu2 %v1587_v54 }
  0x42   : > { %1154 = vmatpush.bf16.msra.mxu3 %v1572_v59 }
  0x43   : > { %1059 = vmatpush.bf16.msra.mxu2 %v1586_v58 }
  0x46   : > { %1060 = vmatmul.bf16.vlgmr.msra.gmra.mxu2 %v1578_v61  ;;  %1155 = vmatpush.bf16.msra.mxu3 %v1571_v62  ;;  %v1584_v61 = vld [vmem:[%s1932_s16 + $0x30] sm:$0xff] }
  0x4a   : > { %1156 = vmatpush.bf16.msra.mxu3 %v1570_v3 }
  0x4d   : > { %657 = vmatmul.bf16.gmra.mxu0 %v483_v63  ;;  %706 = vmatmul.bf16.gmra.mxu1 %v484_v0  ;;  %v1638_v63 = vunpack.c.0.s8 %v1688_v60  ;;  %v1640_v0 = vunpack.c.2.s8 %v1688_v60 }
  0x4f   : > { %v475_v4 = vcvt.s32.f32 %v1638_v63  ;;  %v477_v5 = vcvt.s32.f32 %v1640_v0 }
  0x51   : > { %v493_v8 = vpack.c.bf16 %v477_v5, %v475_v4 }
  0x56   : > { %1065 = vmatmul.bf16.gmra.mxu2 %v1579_v10 }
  0x5d   : > { %662 = vmatmul.bf16.gmra.mxu0 %v485_v11  ;;  %711 = vmatmul.bf16.gmra.mxu1 %v486_v12 }
  0x66   : > { %1070 = vmatmul.bf16.gmra.mxu2 %v1580_v14 }
  0x6d   : > { %667 = vmatmul.bf16.gmra.mxu0 %v487_v22  ;;  %716 = vmatmul.bf16.gmra.mxu1 %v488_v23 }
  0x6f   : > { %v827_v35 = vpop.permute.xlu2 %826 }
  0x76   : > { %1075 = vmatmul.bf16.gmra.mxu2 %v1581_v26 }
  0x77   : > { %v832_v43 = vpop.permute.xlu2 %831 }
  0x7d   : > { %672 = vmatmul.bf16.gmra.mxu0 %v489_v37  ;;  %721 = vmatmul.bf16.gmra.mxu1 %v490_v38  ;;  %v1582_v38 = vld [vmem:[%s1932_s16 + $0x20] sm:$0xff] }
  0x7f   : > { %v847_v3 = vpop.permute.xlu2 %846 }
  0x82   : > { %v807_v11 = vpop.permute.xlu0 %806  ;;  %v817_v23 = vpop.permute.xlu1 %816 }
  0x86   : > { %1080 = vmatmul.bf16.gmra.mxu2 %v1582_v38 }
  0x8a   : > { %v812_v19 = vpop.permute.xlu0 %811  ;;  %v822_v31 = vpop.permute.xlu1 %821 }
  0x8d   : > { %677 = vmatmul.bf16.gmra.mxu0 %v491_v56  ;;  %726 = vmatmul.bf16.gmra.mxu1 %v492_v57 }
  0x92   : > { %v837_v54 = vpop.permute.xlu0 %836  ;;  %v842_v55 = vpop.permute.xlu1 %841 }
  0x96   : > { %1085 = vmatmul.bf16.gmra.mxu2 %v1583_v49 }
  0x9a   : > { %v852_v2 = vpop.permute.xlu0 %851  ;;  %v857_v14 = vpop.permute.xlu1 %856 }
  0x9d   : > { %682 = vmatmul.bf16.gmra.mxu0 %v493_v8  ;;  %731 = vmatmul.bf16.gmra.mxu1 %v494_v9  ;;  %v1585_v9 = vld [vmem:[%s1932_s16 + $0x38] sm:$0xff] }
  0xa2   : > { %v872_v26 = vpop.permute.xlu1 %871 }
  0xa6   : > { %1090 = vmatmul.bf16.gmra.mxu2 %v1584_v61 }
  0xaa   : > { %v648_v12 = vpop.f32.mrf.mxu0  ;;  %v697_v13 = vpop.f32.mrf.mxu1 }
  0xab   : > { %v698_v15 = vadd.f32 %v697_v13, %v648_v12 }
  0xad   : > { %v884_v20 = vmul.f32 %v807_v11, %v698_v15  ;;  %v862_v15 = vpop.permute.xlu2 %861 }
  0xb2   : > { %v650_v16 = vpop.f32.mrf.mxu0  ;;  %v699_v17 = vpop.f32.mrf.mxu1 }
  0xb3   : > { %v700_v18 = vadd.f32 %v699_v17, %v650_v16 }
  0xb5   : > { %v885_v21 = vmul.f32 %v812_v19, %v700_v18  ;;  %v877_v38 = vpop.permute.xlu2 %876 }
  0xb6   : > { %1095 = vmatmul.bf16.gmra.mxu2 %v1585_v9 }
  0xb7   : > { %v900_v22 = vpack.c.bf16 %v885_v21, %v884_v20 }
  0xb9   : > { %1157 = vmatmul.bf16.vlgmr.msra.gmra.mxu3 %v900_v22 }
  0xba   : > { %v653_v24 = vpop.f32.mrf.mxu0  ;;  %v702_v25 = vpop.f32.mrf.mxu1 }
  0xbb   : > { %v703_v27 = vadd.f32 %v702_v25, %v653_v24  ;;  %v867_v25 = vpop.permute.xlu0 %866 }
  0xbd   : > { %v886_v32 = vmul.f32 %v817_v23, %v703_v27 }
  0xc2   : > { %v655_v28 = vpop.f32.mrf.mxu0  ;;  %v704_v29 = vpop.f32.mrf.mxu1 }
  0xc3   : > { %v705_v30 = vadd.f32 %v704_v29, %v655_v28 }
  0xc5   : > { %v887_v33 = vmul.f32 %v822_v31, %v705_v30 }
  0xc7   : > { %v901_v34 = vpack.c.bf16 %v887_v33, %v886_v32 }
  0xc9   : > { %1162 = vmatmul.bf16.gmra.mxu3 %v901_v34  ;;  %v1061_v32 = vpop.f32.mrf.mxu2 }
  0xca   : > { %v658_v36 = vpop.f32.mrf.mxu0  ;;  %v707_v37 = vpop.f32.mrf.mxu1 }
  0xcb   : > { %v708_v39 = vadd.f32 %v707_v37, %v658_v36  ;;  %v882_v37 = vpop.permute.xlu0 %881 }
  0xcd   : > { %v888_v44 = vmul.f32 %v827_v35, %v708_v39 }
  0xd2   : > { %v660_v40 = vpop.f32.mrf.mxu0  ;;  %v709_v41 = vpop.f32.mrf.mxu1 }
  0xd3   : > { %v710_v42 = vadd.f32 %v709_v41, %v660_v40 }
  0xd5   : > { %v889_v45 = vmul.f32 %v832_v43, %v710_v42  ;;  %v1063_v42 = vpop.f32.mrf.mxu2 }
  0xd7   : > { %v902_v46 = vpack.c.bf16 %v889_v45, %v888_v44 }
  0xd9   : > { %1167 = vmatmul.bf16.gmra.mxu3 %v902_v46 }
  0xda   : > { %v663_v47 = vpop.f32.mrf.mxu0  ;;  %v712_v48 = vpop.f32.mrf.mxu1 }
  0xdb   : > { %v713_v50 = vadd.f32 %v712_v48, %v663_v47  ;;  %v1958_v47 = vld [vmem:[%s2005_s6] ss:$0 sm:$0xff] }
  0xdd   : > { %v890_v56 = vmul.f32 %v837_v54, %v713_v50  ;;  %v1066_v43 = vpop.f32.mrf.mxu2 }
  0xe2   : > { %v665_v51 = vpop.f32.mrf.mxu0  ;;  %v714_v52 = vpop.f32.mrf.mxu1 }
  0xe3   : > { %v715_v53 = vadd.f32 %v714_v52, %v665_v51 }
  0xe5   : > { %v891_v57 = vmul.f32 %v842_v55, %v715_v53  ;;  %v1068_v45 = vpop.f32.mrf.mxu2 }
  0xe7   : > { %v903_v58 = vpack.c.bf16 %v891_v57, %v890_v56 }
  0xe9   : > { %1172 = vmatmul.bf16.gmra.mxu3 %v903_v58 }
  0xea   : > { %v668_v59 = vpop.f32.mrf.mxu0  ;;  %v717_v60 = vpop.f32.mrf.mxu1 }
  0xeb   : > { %v718_v62 = vadd.f32 %v717_v60, %v668_v59 }
  0xed   : > { %v892_v4 = vmul.f32 %v847_v3, %v718_v62  ;;  %v1071_v51 = vpop.f32.mrf.mxu2 }
  0xf2   : > { %v670_v63 = vpop.f32.mrf.mxu0  ;;  %v719_v0 = vpop.f32.mrf.mxu1 }
  0xf3   : > { %v720_v1 = vadd.f32 %v719_v0, %v670_v63 }
  0xf5   : > { %v893_v5 = vmul.f32 %v852_v2, %v720_v1  ;;  %v1073_v57 = vpop.f32.mrf.mxu2 }
  0xf7   : > { %v904_v6 = vpack.c.bf16 %v893_v5, %v892_v4 }
  0xf9   : > { %1177 = vmatmul.bf16.gmra.mxu3 %v904_v6 }
  0xfa   : > { %v673_v7 = vpop.f32.mrf.mxu0  ;;  %v722_v8 = vpop.f32.mrf.mxu1 }
  0xfb   : > { %v723_v10 = vadd.f32 %v722_v8, %v673_v7 }
  0xfd   : > { %v894_v16 = vmul.f32 %v857_v14, %v723_v10  ;;  %v1076_v1 = vpop.f32.mrf.mxu2 }
 0x102   : > { %v675_v11 = vpop.f32.mrf.mxu0  ;;  %v724_v12 = vpop.f32.mrf.mxu1 }
 0x103   : > { %v725_v13 = vadd.f32 %v724_v12, %v675_v11 }
 0x105   : > { %v895_v17 = vmul.f32 %v862_v15, %v725_v13  ;;  %v1078_v6 = vpop.f32.mrf.mxu2 }
 0x107   : > { %v905_v18 = vpack.c.bf16 %v895_v17, %v894_v16 }
 0x109   : > { %1182 = vmatmul.bf16.gmra.mxu3 %v905_v18 }
 0x10a   : > { %v678_v19 = vpop.f32.mrf.mxu0  ;;  %v727_v20 = vpop.f32.mrf.mxu1 }
 0x10b   : > { %v728_v21 = vadd.f32 %v727_v20, %v678_v19 }
 0x10d   : > { %v896_v27 = vmul.f32 %v867_v25, %v728_v21  ;;  %v1081_v14 = vpop.f32.mrf.mxu2 }
 0x112   : > { %v680_v22 = vpop.f32.mrf.mxu0  ;;  %v729_v23 = vpop.f32.mrf.mxu1 }
 0x113   : > { %v730_v24 = vadd.f32 %v729_v23, %v680_v22 }
 0x115   : > { %v897_v28 = vmul.f32 %v872_v26, %v730_v24  ;;  %v1083_v20 = vpop.f32.mrf.mxu2 }
 0x117   : > { %v906_v29 = vpack.c.bf16 %v897_v28, %v896_v27 }
 0x119   : > { %1187 = vmatmul.bf16.gmra.mxu3 %v906_v29 }
 0x11a   : > { %v683_v30 = vpop.f32.mrf.mxu0  ;;  %v732_v31 = vpop.f32.mrf.mxu1 }
 0x11b   : > { %v733_v33 = vadd.f32 %v732_v31, %v683_v30 }
 0x11d   : > { %v898_v39 = vmul.f32 %v877_v38, %v733_v33  ;;  %v1086_v26 = vpop.f32.mrf.mxu2 }
 0x122   : > { %v685_v34 = vpop.f32.mrf.mxu0  ;;  %v734_v35 = vpop.f32.mrf.mxu1 }
 0x123   : > { %v735_v36 = vadd.f32 %v734_v35, %v685_v34 }
 0x125   : > { %v899_v40 = vmul.f32 %v882_v37, %v735_v36  ;;  %v1088_v34 = vpop.f32.mrf.mxu2 }
 0x127   : > { %v907_v41 = vpack.c.bf16 %v899_v40, %v898_v39 }
 0x129   : > { %1192 = vmatmul.bf16.gmra.mxu3 %v907_v41 }
 0x12d   : > { %v1091_v40 = vpop.f32.mrf.mxu2 }
 0x13c   : > { %v1158_v44 = vpop.f32.mrf.mxu3 }
 0x13d   : > { %v1159_v46 = vadd.f32 %v1158_v44, %v1061_v32 }
 0x13f   : > { %v1202_v49 = vadd.f32 %v1958_v47, %v1159_v46  ;;  %v1093_v46 = vpop.f32.mrf.mxu2 }
 0x141   : > { %v1218_v53 = vmax.f32 %v1202_v49, 0.0 }
 0x144   : > { %v1160_v48 = vpop.f32.mrf.mxu3 }
 0x145   : > { %v1161_v50 = vadd.f32 %v1160_v48, %v1063_v42 }
 0x147   : > { %v1203_v52 = vadd.f32 %v1958_v47, %v1161_v50 }
 0x149   : > { %v1219_v54 = vmax.f32 %v1203_v52, 0.0 }
 0x14b   : > { %v1645_v55 = vpack.c.bf16 %v1219_v54, %v1218_v53 }
 0x14c   : > { %v1163_v56 = vpop.f32.mrf.mxu3 }
 0x14d   : > { %1646 = vst [vmem:[%s1966_s10] sm:$0xff] %v1645_v55   ;;  %v1164_v58 = vadd.f32 %v1163_v56, %v1066_v43  ;;  %v1096_v55 = vpop.f32.mrf.mxu2 }
 0x14f   : > { %v1204_v60 = vadd.f32 %v1958_v47, %v1164_v58 }
 0x151   : > { %v1220_v63 = vmax.f32 %v1204_v60, 0.0 }
 0x154   : > { %v1165_v59 = vpop.f32.mrf.mxu3 }
 0x155   : > { %v1166_v61 = vadd.f32 %v1165_v59, %v1068_v45  ;;  %v1098_v59 = vpop.f32.mrf.mxu2 }
 0x157   : > { %v1205_v62 = vadd.f32 %v1958_v47, %v1166_v61 }
 0x159   : > { %v1221_v0 = vmax.f32 %v1205_v62, 0.0 }
 0x15b   : > { %v1650_v2 = vpack.c.bf16 %v1221_v0, %v1220_v63 }
 0x15c   : > { %v1168_v3 = vpop.f32.mrf.mxu3 }
 0x15d   : > { %1689 = vst [vmem:[%s1966_s10 + $0x8] sm:$0xff] %v1650_v2   ;;  %v1169_v4 = vadd.f32 %v1168_v3, %v1071_v51 }
 0x15f   : > { %v1206_v7 = vadd.f32 %v1958_v47, %v1169_v4 }
 0x161   : > { %v1222_v10 = vmax.f32 %v1206_v7, 0.0 }
 0x164   : > { %v1170_v5 = vpop.f32.mrf.mxu3 }
 0x165   : > { %v1171_v8 = vadd.f32 %v1170_v5, %v1073_v57 }
 0x167   : > { %v1207_v9 = vadd.f32 %v1958_v47, %v1171_v8 }
 0x169   : > { %v1223_v11 = vmax.f32 %v1207_v9, 0.0 }
 0x16b   : > { %v1655_v12 = vpack.c.bf16 %v1223_v11, %v1222_v10 }
 0x16c   : > { %v1173_v13 = vpop.f32.mrf.mxu3 }
 0x16d   : > { %1690 = vst [vmem:[%s1966_s10 + $0x10] sm:$0xff] %v1655_v12   ;;  %v1174_v15 = vadd.f32 %v1173_v13, %v1076_v1 }
 0x16f   : > { %v1208_v17 = vadd.f32 %v1958_v47, %v1174_v15 }
 0x171   : > { %v1224_v21 = vmax.f32 %v1208_v17, 0.0 }
 0x174   : > { %v1175_v16 = vpop.f32.mrf.mxu3 }
 0x175   : > { %v1176_v18 = vadd.f32 %v1175_v16, %v1078_v6 }
 0x177   : > { %v1209_v19 = vadd.f32 %v1958_v47, %v1176_v18 }
 0x179   : > { %v1225_v22 = vmax.f32 %v1209_v19, 0.0 }
 0x17b   : > { %v1660_v23 = vpack.c.bf16 %v1225_v22, %v1224_v21 }
 0x17c   : > { %v1178_v24 = vpop.f32.mrf.mxu3 }
 0x17d   : > { %1691 = vst [vmem:[%s1966_s10 + $0x18] sm:$0xff] %v1660_v23   ;;  %v1179_v25 = vadd.f32 %v1178_v24, %v1081_v14 }
 0x17f   : > { %v1210_v28 = vadd.f32 %v1958_v47, %v1179_v25 }
 0x181   : > { %v1226_v31 = vmax.f32 %v1210_v28, 0.0 }
 0x184   : > { %v1180_v27 = vpop.f32.mrf.mxu3 }
 0x185   : > { %v1181_v29 = vadd.f32 %v1180_v27, %v1083_v20 }
 0x187   : > { %v1211_v30 = vadd.f32 %v1958_v47, %v1181_v29 }
 0x189   : > { %v1227_v32 = vmax.f32 %v1211_v30, 0.0 }
 0x18b   : > { %v1665_v33 = vpack.c.bf16 %v1227_v32, %v1226_v31 }
 0x18c   : > { %v1183_v35 = vpop.f32.mrf.mxu3 }
 0x18d   : > { %1692 = vst [vmem:[%s1966_s10 + $0x20] sm:$0xff] %v1665_v33   ;;  %v1184_v36 = vadd.f32 %v1183_v35, %v1086_v26 }
 0x18f   : > { %v1212_v38 = vadd.f32 %v1958_v47, %v1184_v36 }
 0x191   : > { %v1228_v42 = vmax.f32 %v1212_v38, 0.0 }
 0x194   : > { %v1185_v37 = vpop.f32.mrf.mxu3 }
 0x195   : > { %v1186_v39 = vadd.f32 %v1185_v37, %v1088_v34 }
 0x197   : > { %v1213_v41 = vadd.f32 %v1958_v47, %v1186_v39 }
 0x199   : > { %v1229_v43 = vmax.f32 %v1213_v41, 0.0 }
 0x19b   : > { %v1670_v44 = vpack.c.bf16 %v1229_v43, %v1228_v42 }
 0x19c   : > { %v1188_v45 = vpop.f32.mrf.mxu3 }
 0x19d   : > { %1693 = vst [vmem:[%s1966_s10 + $0x28] sm:$0xff] %v1670_v44   ;;  %v1189_v48 = vadd.f32 %v1188_v45, %v1091_v40 }
 0x19f   : > { %v1214_v50 = vadd.f32 %v1958_v47, %v1189_v48 }
 0x1a1   : > { %v1230_v53 = vmax.f32 %v1214_v50, 0.0 }
 0x1a4   : > { %v1190_v49 = vpop.f32.mrf.mxu3 }
 0x1a5   : > { %v1191_v51 = vadd.f32 %v1190_v49, %v1093_v46 }
 0x1a7   : > { %v1215_v52 = vadd.f32 %v1958_v47, %v1191_v51 }
 0x1a9   : > { %v1231_v54 = vmax.f32 %v1215_v52, 0.0 }
 0x1ab   : > { %v1675_v56 = vpack.c.bf16 %v1231_v54, %v1230_v53 }
 0x1ac   : > { %v1193_v57 = vpop.f32.mrf.mxu3 }
 0x1ad   : > { %1694 = vst [vmem:[%s1966_s10 + $0x30] sm:$0xff] %v1675_v56   ;;  %v1194_v58 = vadd.f32 %v1193_v57, %v1096_v55 }
 0x1af   : > { %v1216_v61 = vadd.f32 %v1958_v47, %v1194_v58 }
 0x1b1   : > { %v1232_v0 = vmax.f32 %v1216_v61, 0.0 }
 0x1b4   : > { %v1195_v60 = vpop.f32.mrf.mxu3 }
 0x1b5   : > { %v1196_v62 = vadd.f32 %v1195_v60, %v1098_v59 }
 0x1b7   : > { %v1217_v63 = vadd.f32 %v1958_v47, %v1196_v62 }
 0x1b9   : > { %v1233_v1 = vmax.f32 %v1217_v63, 0.0 }
 0x1bb   : > { %v1680_v2 = vpack.c.bf16 %v1233_v1, %v1232_v0 }
 0x1bd   : > { %1695 = vst [vmem:[%s1966_s10 + $0x38] sm:$0xff] %v1680_v2  }
 0x1be PF: > { %s17_s26 = sadd.s32 1, %s1747_s26   ;;  %s2007_s24 = smov %s1743_s25 }
 0x1bf   : > { %p14_p5 = scmp.ge.s32.totalorder %s17_s26, 4   ;;  %s2008_s25 = smov %s2010_s27 }
 0x1c1   :  { %16 = sbr.rel (!%p14_p5) target bundleno = 2 (0x2), region = 95 }

</bundles_post_ra>
